<compile_context>
chip_gen: v6e
topology: v6e:2x2x1
jax: 0.10.0
libtpu: 0.0.40
codegen_flags: <defaults>
</compile_context>

<pallas_src>
import jax
import jax.numpy as jnp
from jax.experimental import pallas as pl
from jax.experimental.pallas import tpu as pltpu

LANES = 128
NUM_CLASSES = 10
C1_TRUE, C1_PAD = 6, 8          # conv1 out channels (true / carried)
C2_TRUE = 16                    # conv2 out channels (true)
CONV1_K = 80                    # 5*5*3 = 75  -> padded to multiple of 16
CONV2_K = 80                    # 3*3*8 = 72  -> padded to multiple of 16
FC1_K = 6 * 6 * C2_TRUE         # 576
_VMEM_LIMIT = 32 * 1024 * 1024  # fits v5e/v6e/v7x scoped budgets


def _round_up(n, m):
    return ((n + m - 1) // m) * m


def _cdiv(a, b):
    return -(-a // b)


def _pick_tile(n_rows, tile_max, align=16, min_grid=2):
    """Row tile + grid count: >=2 grid steps when there are enough rows (so a
    v7x 'parallel' axis can split across both TensorCores), capped at tile_max
    rows per step, tile aligned for bf16 sublane packing."""
    n = max(1, _cdiv(n_rows, tile_max))
    if n < min_grid and n_rows >= min_grid * align:
        n = min_grid
    tile = _round_up(_cdiv(n_rows, n), align)
    n = _cdiv(n_rows, tile)
    return tile, n


# ----------------------------------------------------------------------------
# Pallas kernels
# ----------------------------------------------------------------------------
def _conv_relu_pool_kernel(p_ref, w_ref, b_ref, o_ref):
    """Fused conv-as-matmul + 2x2 max-pool + bias + ReLU.

    p_ref: [4, TM, K] bf16  im2col patches, leading axis = four pool taps
    w_ref: [K, 128]   bf16  conv weight (Cout zero-padded to 128 lanes)
    b_ref: [1, 128]   f32
    o_ref: [TM, 128]  bf16  pooled output rows (lane-dense)

    Pool-max is taken over the raw f32 dot results first; bias + ReLU once.
    (bias is tap-invariant and ReLU is monotone, so this equals relu(conv+b)
    followed by max-pool.)
    """
    w = w_ref[...]
    acc = jnp.dot(p_ref[0], w, preferred_element_type=jnp.float32)
    for t in range(1, 4):
        acc = jnp.maximum(
            acc, jnp.dot(p_ref[t], w, preferred_element_type=jnp.float32))
    o_ref[...] = jnp.maximum(acc + b_ref[...], 0.0).astype(o_ref.dtype)


def _fc_head_kernel(x_ref, w1_ref, b1_ref, w2_ref, b2_ref, w3_ref, b3_ref,
                    o_ref):
    """fc1+ReLU -> fc2+ReLU -> fc3 -> log_softmax; intermediates never leave
    VMEM/vregs.  Matmuls in bf16 with f32 accumulation; mask + softmax in f32."""
    h = jnp.dot(x_ref[...], w1_ref[...], preferred_element_type=jnp.float32)
    h = jnp.maximum(h + b1_ref[...], 0.0).astype(w2_ref.dtype)
    h = jnp.dot(h, w2_ref[...], preferred_element_type=jnp.float32)
    h = jnp.maximum(h + b2_ref[...], 0.0).astype(w3_ref.dtype)
    z = jnp.dot(h, w3_ref[...], preferred_element_type=jnp.float32) + b3_ref[...]
    lane = jax.lax.broadcasted_iota(jnp.int32, z.shape, dimension=1)
    z = jnp.where(lane < NUM_CLASSES, z, jnp.float32(-1e30))
    m = jnp.max(z, axis=-1, keepdims=True)
    lse = m + jnp.log(jnp.sum(jnp.exp(z - m), axis=-1, keepdims=True))
    o_ref[...] = (z - lse).astype(o_ref.dtype)


# ----------------------------------------------------------------------------
# pallas_call wrappers
# ----------------------------------------------------------------------------
def conv_relu_pool(patches, w, b, *, tile_m=512):
    """patches: [4, P, K0] bf16, w: [Kp, 128] bf16, b: [1, 128] f32
    -> pooled rows [P, 128] bf16."""
    _, P, K0 = patches.shape
    Kp, N = w.shape
    if Kp != K0:                                   # pad K to the weight's padded K
        patches = jnp.pad(patches, ((0, 0), (0, 0), (0, Kp - K0)))
    tm, n = _pick_tile(P, tile_m)
    P_pad = tm * n
    if P_pad != P:
        patches = jnp.pad(patches, ((0, 0), (0, P_pad - P), (0, 0)))
    out = pl.pallas_call(
        _conv_relu_pool_kernel,
        out_shape=jax.ShapeDtypeStruct((P_pad, N), jnp.bfloat16),
        grid_spec=pltpu.PrefetchScalarGridSpec(
            num_scalar_prefetch=0,
            grid=(n,),
            in_specs=[
                pl.BlockSpec((4, tm, Kp), lambda i: (0, i, 0)),
                pl.BlockSpec((Kp, N), lambda i: (0, 0)),
                pl.BlockSpec((1, N), lambda i: (0, 0)),
            ],
            out_specs=pl.BlockSpec((tm, N), lambda i: (i, 0)),
        ),
        compiler_params=pltpu.CompilerParams(
            dimension_semantics=("parallel",),
            vmem_limit_bytes=_VMEM_LIMIT),
    )(patches, w, b)
    # padded rows contain relu(bias) garbage -- this slice must stay.
    return out[:P]


def fc_head(x, w1, b1, w2, b2, w3, b3, *, tile_b=512):
    """x: [B, 576] bf16 -> log-probs [B, NUM_CLASSES] f32 (one fused kernel)."""
    B, K = x.shape
    N = w3.shape[1]
    tb, n = _pick_tile(B, tile_b)
    B_pad = tb * n
    if B_pad != B:
        x = jnp.pad(x, ((0, B_pad - B), (0, 0)))
    out = pl.pallas_call(
        _fc_head_kernel,
        out_shape=jax.ShapeDtypeStruct((B_pad, N), jnp.float32),
        grid_spec=pltpu.PrefetchScalarGridSpec(
            num_scalar_prefetch=0,
            grid=(n,),
            in_specs=[
                pl.BlockSpec((tb, K), lambda i: (i, 0)),
                pl.BlockSpec(w1.shape, lambda i: (0, 0)),
                pl.BlockSpec(b1.shape, lambda i: (0, 0)),
                pl.BlockSpec(w2.shape, lambda i: (0, 0)),
                pl.BlockSpec(b2.shape, lambda i: (0, 0)),
                pl.BlockSpec(w3.shape, lambda i: (0, 0)),
                pl.BlockSpec(b3.shape, lambda i: (0, 0)),
            ],
            out_specs=pl.BlockSpec((tb, N), lambda i: (i, 0)),
        ),
        compiler_params=pltpu.CompilerParams(
            dimension_semantics=("parallel",),
            vmem_limit_bytes=_VMEM_LIMIT),
    )(x, w1, b1, w2, b2, w3, b3)
    return out[:B, :NUM_CLASSES]


# ----------------------------------------------------------------------------
# Glue: pool-tap-grouped im2col, parameter packing, forward pass
# ----------------------------------------------------------------------------
def pool_tap_patches(x, k):
    """NHWC x -> im2col patches grouped by the four 2x2 max-pool taps.

    Returns ([4, B*PH*PW, k*k*C], PH, PW) with
      patches[di*2+dj, b*PH*PW + ph*PW + pw, (kh*k+kw)*C + c]
        = x[b, 2*ph + di + kh, 2*pw + dj + kw, c]
    NOTE: assumes even conv-output sizes (true for 28x28 and 12x12 here)."""
    B, H, W, C = x.shape
    oh, ow = H - k + 1, W - k + 1
    ph, pw = oh // 2, ow // 2
    taps = []
    for di in range(2):
        for dj in range(2):
            cols = []
            for kh in range(k):
                for kw in range(k):
                    sl = x[:, di + kh: di + kh + 2 * ph: 2,
                              dj + kw: dj + kw + 2 * pw: 2, :]   # [B, ph, pw, C]
                    cols.append(sl)
            t = jnp.stack(cols, axis=3)                          # [B, ph, pw, k*k, C]
            taps.append(t.reshape(B * ph * pw, k * k * C))
    return jnp.stack(taps, axis=0), ph, pw


def init_raw_params(key):
    """PyTorch-shaped parameters, uniform(-1/sqrt(fan_in), 1/sqrt(fan_in))."""
    ks = jax.random.split(key, 10)

    def u(k, shape, fan_in):
        bound = 1.0 / jnp.sqrt(jnp.float32(fan_in))
        return jax.random.uniform(k, shape, jnp.float32, -bound, bound)

    return {
        "conv1_w": u(ks[0], (6, 3, 5, 5), 3 * 5 * 5),
        "conv1_b": u(ks[1], (6,), 3 * 5 * 5),
        "conv2_w": u(ks[2], (16, 6, 3, 3), 6 * 3 * 3),
        "conv2_b": u(ks[3], (16,), 6 * 3 * 3),
        "fc1_w": u(ks[4], (120, 576), 576),
        "fc1_b": u(ks[5], (120,), 576),
        "fc2_w": u(ks[6], (84, 120), 120),
        "fc2_b": u(ks[7], (84,), 120),
        "fc3_w": u(ks[8], (10, 84), 84),
        "fc3_b": u(ks[9], (10,), 84),
    }


def pack_params(raw):
    """One-time, outside the hot path: repack weights as bf16 lane-padded
    [K, 128] matmul operands with the TRUE (not lane-padded) contraction dims,
    folding all transposes + the PyTorch NCHW flatten into the weights.
    Biases stay f32 (epilogue runs in f32)."""
    def pad_to(a, shape):
        return jnp.pad(a, [(0, t - s) for s, t in zip(a.shape, shape)])

    def pad_bias(b):
        return pad_to(b.reshape(1, -1), (1, LANES)).astype(jnp.float32)

    # conv1: [6,3,5,5] -> [kh,kw,cin,cout] -> [75,6] -> [80,128]
    w1 = jnp.transpose(raw["conv1_w"], (2, 3, 1, 0)).reshape(5 * 5 * 3, C1_TRUE)
    w1 = pad_to(w1, (CONV1_K, LANES)).astype(jnp.bfloat16)
    # conv2: [16,6,3,3] -> [kh,kw,cin,cout]; cin padded 6->8 only, cout->128;
    # rows ordered (kh,kw,cin) to match pool_tap_patches on the sliced carry.
    w2 = jnp.transpose(raw["conv2_w"], (2, 3, 1, 0))             # [3,3,6,16]
    w2 = pad_to(w2, (3, 3, C1_PAD, LANES)).reshape(3 * 3 * C1_PAD, LANES)
    w2 = pad_to(w2, (CONV2_K, LANES)).astype(jnp.bfloat16)       # [80,128]
    # fc1: fold the NCHW .view(-1,576) permutation into the weight: rows
    # ordered (h, w, c) with the TRUE 16 channels -> K = 576 (was 4608).
    wf1 = jnp.transpose(raw["fc1_w"].reshape(120, C2_TRUE, 6, 6), (2, 3, 1, 0))
    wf1 = wf1.reshape(FC1_K, 120)
    wf1 = pad_to(wf1, (FC1_K, LANES)).astype(jnp.bfloat16)       # [576,128]
    wf2 = pad_to(raw["fc2_w"].T, (LANES, LANES)).astype(jnp.bfloat16)
    wf3 = pad_to(raw["fc3_w"].T, (LANES, LANES)).astype(jnp.bfloat16)

    return {
        "conv1_w": w1, "conv1_b": pad_bias(raw["conv1_b"]),
        "conv2_w": w2, "conv2_b": pad_bias(raw["conv2_b"]),
        "fc1_w": wf1, "fc1_b": pad_bias(raw["fc1_b"]),
        "fc2_w": wf2, "fc2_b": pad_bias(raw["fc2_b"]),
        "fc3_w": wf3, "fc3_b": pad_bias(raw["fc3_b"]),
    }


def forward(params, x_nchw):
    B = x_nchw.shape[0]
    x = jnp.transpose(x_nchw, (0, 2, 3, 1)).astype(jnp.bfloat16)   # NHWC bf16

    # conv1(3->6,k=5) + ReLU + 2x2 max-pool, fused; lane-dense [rows,128] out
    p, ph, pw = pool_tap_patches(x, 5)                       # [4, B*196, 75]
    y = conv_relu_pool(p, params["conv1_w"], params["conv1_b"])    # [B*196,128] bf16
    # slice the carry back to its true (8-aligned) channel count before the
    # next contraction: conv2 K = 3*3*8 = 72, not 3*3*128.
    y = y.reshape(B, ph, pw, LANES)[..., :C1_PAD]            # [B,14,14,8], ch 6,7 == 0

    # conv2(6->16,k=3) + ReLU + 2x2 max-pool
    p, ph, pw = pool_tap_patches(y, 3)                       # [4, B*36, 72]
    y = conv_relu_pool(p, params["conv2_w"], params["conv2_b"])    # [B*36,128] bf16
    # slice to the true 16 channels -> fc1 K = 576, not 4608; flatten (h,w,c)
    y = y.reshape(B, ph, pw, LANES)[..., :C2_TRUE].reshape(B, FC1_K)

    # fc1+fc2+fc3+log_softmax fused; flatten permutation already inside fc1_w
    return fc_head(y, params["fc1_w"], params["fc1_b"],
                   params["fc2_w"], params["fc2_b"],
                   params["fc3_w"], params["fc3_b"])         # [B, 10] f32


def reference_forward(raw, x_nchw):
    """Pure-JAX/XLA reference of the PyTorch module (correctness check only)."""
    hp = jax.lax.Precision.HIGHEST
    dn = ("NCHW", "OIHW", "NCHW")
    y = jax.lax.conv_general_dilated(x_nchw, raw["conv1_w"], (1, 1), "VALID",
                                     dimension_numbers=dn, precision=hp)
    y = jax.nn.relu(y + raw["conv1_b"][None, :, None, None])
    y = jax.lax.reduce_window(y, -jnp.inf, jax.lax.max,
                              (1, 1, 2, 2), (1, 1, 2, 2), "VALID")
    y = jax.lax.conv_general_dilated(y, raw["conv2_w"], (1, 1), "VALID",
                                     dimension_numbers=dn, precision=hp)
    y = jax.nn.relu(y + raw["conv2_b"][None, :, None, None])
    y = jax.lax.reduce_window(y, -jnp.inf, jax.lax.max,
                              (1, 1, 2, 2), (1, 1, 2, 2), "VALID")
    y = y.reshape(y.shape[0], -1)
    y = jax.nn.relu(jnp.dot(y, raw["fc1_w"].T, precision=hp) + raw["fc1_b"])
    y = jax.nn.relu(jnp.dot(y, raw["fc2_w"].T, precision=hp) + raw["fc2_b"])
    y = jnp.dot(y, raw["fc3_w"].T, precision=hp) + raw["fc3_b"]
    return jax.nn.log_softmax(y, axis=-1)


if __name__ == "__main__":
    key = jax.random.PRNGKey(0)
    pkey, xkey = jax.random.split(key)
    raw = init_raw_params(pkey)
    params = pack_params(raw)
    # CIFAR-sized input is required by the .view(-1, 6*6*16) flatten; batch = 2.
    x = jax.random.normal(xkey, (2, 3, 32, 32), jnp.float32)

    out = jax.block_until_ready(jax.jit(forward)(params, x))

    assert out.shape == (2, NUM_CLASSES)
    assert bool(jnp.all(jnp.isfinite(out)))
    # log_softmax rows must exponentiate-sum to ~1
    assert bool(jnp.allclose(jnp.sum(jnp.exp(out), axis=1), 1.0, atol=1e-4))
    # must match the pure-XLA f32 reference of the original PyTorch module
    ref = jax.jit(reference_forward)(raw, x)
    assert bool(jnp.allclose(out, ref, atol=2e-2, rtol=2e-2)), \
        float(jnp.max(jnp.abs(out - ref)))
    print("KERNEL_OK")
</pallas_src>

<mosaic_0001>
module attributes {stable_mosaic.version = 11 : i64} {
  func.func @_conv_relu_pool_kernel(%arg0: i32, %arg1: memref<4x208x80xbf16, #tpu.memory_space<vmem>>, %arg2: memref<80x128xbf16, #tpu.memory_space<vmem>>, %arg3: memref<1x128xf32, #tpu.memory_space<vmem>>, %arg4: memref<208x128xbf16, #tpu.memory_space<vmem>>) attributes {dimension_semantics = [#tpu.dimension_semantics<parallel>], iteration_bounds = array<i64: 2>, scalar_prefetch = 0 : i64, scratch_operands = 0 : i64, tpu.core_type = #tpu.core_type<tc>, window_params = [{transform_indices = @transform_0, window_bounds = array<i64: 4, 208, 80>}, {pipeline_mode = #tpu.pipeline_mode<synchronous>, transform_indices = @transform_1, window_bounds = array<i64: 80, 128>}, {pipeline_mode = #tpu.pipeline_mode<synchronous>, transform_indices = @transform_2, window_bounds = array<i64: 1, 128>}, {transform_indices = @transform_3, window_bounds = array<i64: 208, 128>}]} {
    %c0 = arith.constant 0 : index
    %c0_0 = arith.constant 0 : index
    %0 = vector.load %arg2[%c0, %c0_0] : memref<80x128xbf16, #tpu.memory_space<vmem>>, vector<80x128xbf16>
    %c0_1 = arith.constant 0 : index
    %c0_2 = arith.constant 0 : index
    %c0_3 = arith.constant 0 : index
    %1 = vector.load %arg1[%c0_1, %c0_2, %c0_3] : memref<4x208x80xbf16, #tpu.memory_space<vmem>>, vector<1x208x80xbf16>
    %2 = vector.shape_cast %1 : vector<1x208x80xbf16> to vector<208x80xbf16>
    %cst = arith.constant dense<0.000000e+00> : vector<208x128xf32>
    %3 = tpu.matmul %2, %0, %cst {dimension_numbers = #tpu.dot_dimension_numbers<[1], [0], [0], [1], [0, 0, 1, 1], [], []>} : vector<208x80xbf16>, vector<80x128xbf16>, vector<208x128xf32> -> vector<208x128xf32>
    %c1 = arith.constant 1 : index
    %c0_4 = arith.constant 0 : index
    %c0_5 = arith.constant 0 : index
    %4 = vector.load %arg1[%c1, %c0_4, %c0_5] : memref<4x208x80xbf16, #tpu.memory_space<vmem>>, vector<1x208x80xbf16>
    %5 = vector.shape_cast %4 : vector<1x208x80xbf16> to vector<208x80xbf16>
    %cst_6 = arith.constant dense<0.000000e+00> : vector<208x128xf32>
    %6 = tpu.matmul %5, %0, %cst_6 {dimension_numbers = #tpu.dot_dimension_numbers<[1], [0], [0], [1], [0, 0, 1, 1], [], []>} : vector<208x80xbf16>, vector<80x128xbf16>, vector<208x128xf32> -> vector<208x128xf32>
    %7 = arith.maximumf %3, %6 : vector<208x128xf32>
    %c2 = arith.constant 2 : index
    %c0_7 = arith.constant 0 : index
    %c0_8 = arith.constant 0 : index
    %8 = vector.load %arg1[%c2, %c0_7, %c0_8] : memref<4x208x80xbf16, #tpu.memory_space<vmem>>, vector<1x208x80xbf16>
    %9 = vector.shape_cast %8 : vector<1x208x80xbf16> to vector<208x80xbf16>
    %cst_9 = arith.constant dense<0.000000e+00> : vector<208x128xf32>
    %10 = tpu.matmul %9, %0, %cst_9 {dimension_numbers = #tpu.dot_dimension_numbers<[1], [0], [0], [1], [0, 0, 1, 1], [], []>} : vector<208x80xbf16>, vector<80x128xbf16>, vector<208x128xf32> -> vector<208x128xf32>
    %11 = arith.maximumf %7, %10 : vector<208x128xf32>
    %c3 = arith.constant 3 : index
    %c0_10 = arith.constant 0 : index
    %c0_11 = arith.constant 0 : index
    %12 = vector.load %arg1[%c3, %c0_10, %c0_11] : memref<4x208x80xbf16, #tpu.memory_space<vmem>>, vector<1x208x80xbf16>
    %13 = vector.shape_cast %12 : vector<1x208x80xbf16> to vector<208x80xbf16>
    %cst_12 = arith.constant dense<0.000000e+00> : vector<208x128xf32>
    %14 = tpu.matmul %13, %0, %cst_12 {dimension_numbers = #tpu.dot_dimension_numbers<[1], [0], [0], [1], [0, 0, 1, 1], [], []>} : vector<208x80xbf16>, vector<80x128xbf16>, vector<208x128xf32> -> vector<208x128xf32>
    %15 = arith.maximumf %11, %14 : vector<208x128xf32>
    %c0_13 = arith.constant 0 : index
    %c0_14 = arith.constant 0 : index
    %16 = vector.load %arg3[%c0_13, %c0_14] : memref<1x128xf32, #tpu.memory_space<vmem>>, vector<1x128xf32>
    %17 = vector.broadcast %16 : vector<1x128xf32> to vector<208x128xf32>
    %18 = arith.addf %15, %17 : vector<208x128xf32>
    %cst_15 = arith.constant 0.000000e+00 : f32
    %19 = vector.broadcast %cst_15 : f32 to vector<208x128xf32>
    %20 = arith.maximumf %18, %19 : vector<208x128xf32>
    %21 = arith.truncf %20 : vector<208x128xf32> to vector<208x128xbf16>
    %c0_16 = arith.constant 0 : index
    %c0_17 = arith.constant 0 : index
    %22 = vector.load %arg4[%c0_16, %c0_17] : memref<208x128xbf16, #tpu.memory_space<vmem>>, vector<208x128xbf16>
    tpu.vector_store %arg4[%c0_16, %c0_17], %21 {strides = array<i32>} : memref<208x128xbf16, #tpu.memory_space<vmem>>, vector<208x128xbf16>,
    return
  }
  func.func @transform_0(%arg0: i32) -> (i32, i32, i32) {
    %c0_i32 = arith.constant 0 : i32
    %c0_i32_0 = arith.constant 0 : i32
    %c0_i32_1 = arith.constant 0 : i32
    return %c0_i32, %arg0, %c0_i32_0 : i32, i32, i32
  }
  func.func @transform_1(%arg0: i32) -> (i32, i32) {
    %c0_i32 = arith.constant 0 : i32
    %c0_i32_0 = arith.constant 0 : i32
    %c0_i32_1 = arith.constant 0 : i32
    return %c0_i32, %c0_i32_0 : i32, i32
  }
  func.func @transform_2(%arg0: i32) -> (i32, i32) {
    %c0_i32 = arith.constant 0 : i32
    %c0_i32_0 = arith.constant 0 : i32
    %c0_i32_1 = arith.constant 0 : i32
    return %c0_i32, %c0_i32_0 : i32, i32
  }
  func.func @transform_3(%arg0: i32) -> (i32, i32) {
    %c0_i32 = arith.constant 0 : i32
    %c0_i32_0 = arith.constant 0 : i32
    return %arg0, %c0_i32 : i32, i32
  }
}

module attributes {stable_mosaic.version = 11 : i64} {
  func.func @_conv_relu_pool_kernel(%arg0: i32, %arg1: memref<4x48x80xbf16, #tpu.memory_space<vmem>>, %arg2: memref<80x128xbf16, #tpu.memory_space<vmem>>, %arg3: memref<1x128xf32, #tpu.memory_space<vmem>>, %arg4: memref<48x128xbf16, #tpu.memory_space<vmem>>) attributes {dimension_semantics = [#tpu.dimension_semantics<parallel>], iteration_bounds = array<i64: 2>, scalar_prefetch = 0 : i64, scratch_operands = 0 : i64, tpu.core_type = #tpu.core_type<tc>, window_params = [{transform_indices = @transform_0, window_bounds = array<i64: 4, 48, 80>}, {pipeline_mode = #tpu.pipeline_mode<synchronous>, transform_indices = @transform_1, window_bounds = array<i64: 80, 128>}, {pipeline_mode = #tpu.pipeline_mode<synchronous>, transform_indices = @transform_2, window_bounds = array<i64: 1, 128>}, {transform_indices = @transform_3, window_bounds = array<i64: 48, 128>}]} {
    %c0 = arith.constant 0 : index
    %c0_0 = arith.constant 0 : index
    %0 = vector.load %arg2[%c0, %c0_0] : memref<80x128xbf16, #tpu.memory_space<vmem>>, vector<80x128xbf16>
    %c0_1 = arith.constant 0 : index
    %c0_2 = arith.constant 0 : index
    %c0_3 = arith.constant 0 : index
    %1 = vector.load %arg1[%c0_1, %c0_2, %c0_3] : memref<4x48x80xbf16, #tpu.memory_space<vmem>>, vector<1x48x80xbf16>
    %2 = vector.shape_cast %1 : vector<1x48x80xbf16> to vector<48x80xbf16>
    %cst = arith.constant dense<0.000000e+00> : vector<48x128xf32>
    %3 = tpu.matmul %2, %0, %cst {dimension_numbers = #tpu.dot_dimension_numbers<[1], [0], [0], [1], [0, 0, 1, 1], [], []>} : vector<48x80xbf16>, vector<80x128xbf16>, vector<48x128xf32> -> vector<48x128xf32>
    %c1 = arith.constant 1 : index
    %c0_4 = arith.constant 0 : index
    %c0_5 = arith.constant 0 : index
    %4 = vector.load %arg1[%c1, %c0_4, %c0_5] : memref<4x48x80xbf16, #tpu.memory_space<vmem>>, vector<1x48x80xbf16>
    %5 = vector.shape_cast %4 : vector<1x48x80xbf16> to vector<48x80xbf16>
    %cst_6 = arith.constant dense<0.000000e+00> : vector<48x128xf32>
    %6 = tpu.matmul %5, %0, %cst_6 {dimension_numbers = #tpu.dot_dimension_numbers<[1], [0], [0], [1], [0, 0, 1, 1], [], []>} : vector<48x80xbf16>, vector<80x128xbf16>, vector<48x128xf32> -> vector<48x128xf32>
    %7 = arith.maximumf %3, %6 : vector<48x128xf32>
    %c2 = arith.constant 2 : index
    %c0_7 = arith.constant 0 : index
    %c0_8 = arith.constant 0 : index
    %8 = vector.load %arg1[%c2, %c0_7, %c0_8] : memref<4x48x80xbf16, #tpu.memory_space<vmem>>, vector<1x48x80xbf16>
    %9 = vector.shape_cast %8 : vector<1x48x80xbf16> to vector<48x80xbf16>
    %cst_9 = arith.constant dense<0.000000e+00> : vector<48x128xf32>
    %10 = tpu.matmul %9, %0, %cst_9 {dimension_numbers = #tpu.dot_dimension_numbers<[1], [0], [0], [1], [0, 0, 1, 1], [], []>} : vector<48x80xbf16>, vector<80x128xbf16>, vector<48x128xf32> -> vector<48x128xf32>
    %11 = arith.maximumf %7, %10 : vector<48x128xf32>
    %c3 = arith.constant 3 : index
    %c0_10 = arith.constant 0 : index
    %c0_11 = arith.constant 0 : index
    %12 = vector.load %arg1[%c3, %c0_10, %c0_11] : memref<4x48x80xbf16, #tpu.memory_space<vmem>>, vector<1x48x80xbf16>
    %13 = vector.shape_cast %12 : vector<1x48x80xbf16> to vector<48x80xbf16>
    %cst_12 = arith.constant dense<0.000000e+00> : vector<48x128xf32>
    %14 = tpu.matmul %13, %0, %cst_12 {dimension_numbers = #tpu.dot_dimension_numbers<[1], [0], [0], [1], [0, 0, 1, 1], [], []>} : vector<48x80xbf16>, vector<80x128xbf16>, vector<48x128xf32> -> vector<48x128xf32>
    %15 = arith.maximumf %11, %14 : vector<48x128xf32>
    %c0_13 = arith.constant 0 : index
    %c0_14 = arith.constant 0 : index
    %16 = vector.load %arg3[%c0_13, %c0_14] : memref<1x128xf32, #tpu.memory_space<vmem>>, vector<1x128xf32>
    %17 = vector.broadcast %16 : vector<1x128xf32> to vector<48x128xf32>
    %18 = arith.addf %15, %17 : vector<48x128xf32>
    %cst_15 = arith.constant 0.000000e+00 : f32
    %19 = vector.broadcast %cst_15 : f32 to vector<48x128xf32>
    %20 = arith.maximumf %18, %19 : vector<48x128xf32>
    %21 = arith.truncf %20 : vector<48x128xf32> to vector<48x128xbf16>
    %c0_16 = arith.constant 0 : index
    %c0_17 = arith.constant 0 : index
    %22 = vector.load %arg4[%c0_16, %c0_17] : memref<48x128xbf16, #tpu.memory_space<vmem>>, vector<48x128xbf16>
    tpu.vector_store %arg4[%c0_16, %c0_17], %21 {strides = array<i32>} : memref<48x128xbf16, #tpu.memory_space<vmem>>, vector<48x128xbf16>,
    return
  }
  func.func @transform_0(%arg0: i32) -> (i32, i32, i32) {
    %c0_i32 = arith.constant 0 : i32
    %c0_i32_0 = arith.constant 0 : i32
    %c0_i32_1 = arith.constant 0 : i32
    return %c0_i32, %arg0, %c0_i32_0 : i32, i32, i32
  }
  func.func @transform_1(%arg0: i32) -> (i32, i32) {
    %c0_i32 = arith.constant 0 : i32
    %c0_i32_0 = arith.constant 0 : i32
    %c0_i32_1 = arith.constant 0 : i32
    return %c0_i32, %c0_i32_0 : i32, i32
  }
  func.func @transform_2(%arg0: i32) -> (i32, i32) {
    %c0_i32 = arith.constant 0 : i32
    %c0_i32_0 = arith.constant 0 : i32
    %c0_i32_1 = arith.constant 0 : i32
    return %c0_i32, %c0_i32_0 : i32, i32
  }
  func.func @transform_3(%arg0: i32) -> (i32, i32) {
    %c0_i32 = arith.constant 0 : i32
    %c0_i32_0 = arith.constant 0 : i32
    return %arg0, %c0_i32 : i32, i32
  }
}

module attributes {stable_mosaic.version = 11 : i64} {
  func.func @_fc_head_kernel(%arg0: i32, %arg1: memref<16x576xbf16, #tpu.memory_space<vmem>>, %arg2: memref<576x128xbf16, #tpu.memory_space<vmem>>, %arg3: memref<1x128xf32, #tpu.memory_space<vmem>>, %arg4: memref<128x128xbf16, #tpu.memory_space<vmem>>, %arg5: memref<1x128xf32, #tpu.memory_space<vmem>>, %arg6: memref<128x128xbf16, #tpu.memory_space<vmem>>, %arg7: memref<1x128xf32, #tpu.memory_space<vmem>>, %arg8: memref<16x128xf32, #tpu.memory_space<vmem>>) attributes {dimension_semantics = [#tpu.dimension_semantics<parallel>], iteration_bounds = array<i64: 1>, scalar_prefetch = 0 : i64, scratch_operands = 0 : i64, tpu.core_type = #tpu.core_type<tc>, window_params = [{transform_indices = @transform_0, window_bounds = array<i64: 16, 576>}, {pipeline_mode = #tpu.pipeline_mode<synchronous>, transform_indices = @transform_1, window_bounds = array<i64: 576, 128>}, {pipeline_mode = #tpu.pipeline_mode<synchronous>, transform_indices = @transform_2, window_bounds = array<i64: 1, 128>}, {pipeline_mode = #tpu.pipeline_mode<synchronous>, transform_indices = @transform_3, window_bounds = array<i64: 128, 128>}, {pipeline_mode = #tpu.pipeline_mode<synchronous>, transform_indices = @transform_4, window_bounds = array<i64: 1, 128>}, {pipeline_mode = #tpu.pipeline_mode<synchronous>, transform_indices = @transform_5, window_bounds = array<i64: 128, 128>}, {pipeline_mode = #tpu.pipeline_mode<synchronous>, transform_indices = @transform_6, window_bounds = array<i64: 1, 128>}, {transform_indices = @transform_7, window_bounds = array<i64: 16, 128>}]} {
    %c0 = arith.constant 0 : index
    %c0_0 = arith.constant 0 : index
    %0 = vector.load %arg1[%c0, %c0_0] : memref<16x576xbf16, #tpu.memory_space<vmem>>, vector<16x576xbf16>
    %c0_1 = arith.constant 0 : index
    %c0_2 = arith.constant 0 : index
    %1 = vector.load %arg2[%c0_1, %c0_2] : memref<576x128xbf16, #tpu.memory_space<vmem>>, vector<576x128xbf16>
    %cst = arith.constant dense<0.000000e+00> : vector<16x128xf32>
    %2 = tpu.matmul %0, %1, %cst {dimension_numbers = #tpu.dot_dimension_numbers<[1], [0], [0], [1], [0, 0, 1, 1], [], []>} : vector<16x576xbf16>, vector<576x128xbf16>, vector<16x128xf32> -> vector<16x128xf32>
    %c0_3 = arith.constant 0 : index
    %c0_4 = arith.constant 0 : index
    %3 = vector.load %arg3[%c0_3, %c0_4] : memref<1x128xf32, #tpu.memory_space<vmem>>, vector<1x128xf32>
    %4 = vector.broadcast %3 : vector<1x128xf32> to vector<16x128xf32>
    %5 = arith.addf %2, %4 : vector<16x128xf32>
    %cst_5 = arith.constant 0.000000e+00 : f32
    %6 = vector.broadcast %cst_5 : f32 to vector<16x128xf32>
    %7 = arith.maximumf %5, %6 : vector<16x128xf32>
    %8 = arith.truncf %7 : vector<16x128xf32> to vector<16x128xbf16>
    %c0_6 = arith.constant 0 : index
    %c0_7 = arith.constant 0 : index
    %9 = vector.load %arg4[%c0_6, %c0_7] : memref<128x128xbf16, #tpu.memory_space<vmem>>, vector<128x128xbf16>
    %cst_8 = arith.constant dense<0.000000e+00> : vector<16x128xf32>
    %10 = tpu.matmul %8, %9, %cst_8 {dimension_numbers = #tpu.dot_dimension_numbers<[1], [0], [0], [1], [0, 0, 1, 1], [], []>} : vector<16x128xbf16>, vector<128x128xbf16>, vector<16x128xf32> -> vector<16x128xf32>
    %c0_9 = arith.constant 0 : index
    %c0_10 = arith.constant 0 : index
    %11 = vector.load %arg5[%c0_9, %c0_10] : memref<1x128xf32, #tpu.memory_space<vmem>>, vector<1x128xf32>
    %12 = vector.broadcast %11 : vector<1x128xf32> to vector<16x128xf32>
    %13 = arith.addf %10, %12 : vector<16x128xf32>
    %cst_11 = arith.constant 0.000000e+00 : f32
    %14 = vector.broadcast %cst_11 : f32 to vector<16x128xf32>
    %15 = arith.maximumf %13, %14 : vector<16x128xf32>
    %16 = arith.truncf %15 : vector<16x128xf32> to vector<16x128xbf16>
    %c0_12 = arith.constant 0 : index
    %c0_13 = arith.constant 0 : index
    %17 = vector.load %arg6[%c0_12, %c0_13] : memref<128x128xbf16, #tpu.memory_space<vmem>>, vector<128x128xbf16>
    %cst_14 = arith.constant dense<0.000000e+00> : vector<16x128xf32>
    %18 = tpu.matmul %16, %17, %cst_14 {dimension_numbers = #tpu.dot_dimension_numbers<[1], [0], [0], [1], [0, 0, 1, 1], [], []>} : vector<16x128xbf16>, vector<128x128xbf16>, vector<16x128xf32> -> vector<16x128xf32>
    %c0_15 = arith.constant 0 : index
    %c0_16 = arith.constant 0 : index
    %19 = vector.load %arg7[%c0_15, %c0_16] : memref<1x128xf32, #tpu.memory_space<vmem>>, vector<1x128xf32>
    %20 = vector.broadcast %19 : vector<1x128xf32> to vector<16x128xf32>
    %21 = arith.addf %18, %20 : vector<16x128xf32>
    %22 = tpu.iota {dimensions = array<i32: 1>} : vector<16x128xi32>
    %c10_i32 = arith.constant 10 : i32
    %23 = vector.broadcast %c10_i32 : i32 to vector<16x128xi32>
    %24 = arith.cmpi slt, %22, %23 : vector<16x128xi32>
    %cst_17 = arith.constant -1.000000e+30 : f32
    %25 = vector.broadcast %cst_17 : f32 to vector<16x128xf32>
    %26 = arith.select %24, %21, %25 : vector<16x128xi1>, vector<16x128xf32>
    %cst_18 = arith.constant dense<0xFF800000> : vector<16xf32>
    %27 = vector.multi_reduction <maximumf>, %26, %cst_18 [1] : vector<16x128xf32> to vector<16xf32>
    %28 = vector.shape_cast %27 : vector<16xf32> to vector<16x1xf32>
    %29 = vector.broadcast %28 : vector<16x1xf32> to vector<16x128xf32>
    %30 = arith.subf %26, %29 : vector<16x128xf32>
    %31 = math.exp %30 : vector<16x128xf32>
    %cst_19 = arith.constant dense<0.000000e+00> : vector<16xf32>
    %32 = vector.multi_reduction <add>, %31, %cst_19 [1] : vector<16x128xf32> to vector<16xf32>
    %33 = vector.shape_cast %32 : vector<16xf32> to vector<16x1xf32>
    %34 = math.log %33 : vector<16x1xf32>
    %35 = arith.addf %28, %34 : vector<16x1xf32>
    %36 = vector.broadcast %35 : vector<16x1xf32> to vector<16x128xf32>
    %37 = arith.subf %26, %36 : vector<16x128xf32>
    %c0_20 = arith.constant 0 : index
    %c0_21 = arith.constant 0 : index
    %38 = vector.load %arg8[%c0_20, %c0_21] : memref<16x128xf32, #tpu.memory_space<vmem>>, vector<16x128xf32>
    tpu.vector_store %arg8[%c0_20, %c0_21], %37 {strides = array<i32>} : memref<16x128xf32, #tpu.memory_space<vmem>>, vector<16x128xf32>,
    return
  }
  func.func @transform_0(%arg0: i32) -> (i32, i32) {
    %c0_i32 = arith.constant 0 : i32
    %c0_i32_0 = arith.constant 0 : i32
    return %arg0, %c0_i32 : i32, i32
  }
  func.func @transform_1(%arg0: i32) -> (i32, i32) {
    %c0_i32 = arith.constant 0 : i32
    %c0_i32_0 = arith.constant 0 : i32
    %c0_i32_1 = arith.constant 0 : i32
    return %c0_i32, %c0_i32_0 : i32, i32
  }
  func.func @transform_2(%arg0: i32) -> (i32, i32) {
    %c0_i32 = arith.constant 0 : i32
    %c0_i32_0 = arith.constant 0 : i32
    %c0_i32_1 = arith.constant 0 : i32
    return %c0_i32, %c0_i32_0 : i32, i32
  }
  func.func @transform_3(%arg0: i32) -> (i32, i32) {
    %c0_i32 = arith.constant 0 : i32
    %c0_i32_0 = arith.constant 0 : i32
    %c0_i32_1 = arith.constant 0 : i32
    return %c0_i32, %c0_i32_0 : i32, i32
  }
  func.func @transform_4(%arg0: i32) -> (i32, i32) {
    %c0_i32 = arith.constant 0 : i32
    %c0_i32_0 = arith.constant 0 : i32
    %c0_i32_1 = arith.constant 0 : i32
    return %c0_i32, %c0_i32_0 : i32, i32
  }
  func.func @transform_5(%arg0: i32) -> (i32, i32) {
    %c0_i32 = arith.constant 0 : i32
    %c0_i32_0 = arith.constant 0 : i32
    %c0_i32_1 = arith.constant 0 : i32
    return %c0_i32, %c0_i32_0 : i32, i32
  }
  func.func @transform_6(%arg0: i32) -> (i32, i32) {
    %c0_i32 = arith.constant 0 : i32
    %c0_i32_0 = arith.constant 0 : i32
    %c0_i32_1 = arith.constant 0 : i32
    return %c0_i32, %c0_i32_0 : i32, i32
  }
  func.func @transform_7(%arg0: i32) -> (i32, i32) {
    %c0_i32 = arith.constant 0 : i32
    %c0_i32_0 = arith.constant 0 : i32
    return %arg0, %c0_i32 : i32, i32
  }
}

</mosaic_0001>

<bundles_post_ra>
// kernel: forward.3
= control target key start
LH: loop header
LB: loop body
LE: loop exit
PB: predicated region body
PF: predicated region fallthrough
CT: control target
= control target key end

     0   :  { %s2849_s12 = smov 0   ;;  %s2851_s13 = smov 0   ;;  %s3534_s0 = inlined_call_operand.vmem [shape: bf16[4,416,80], index: 0, kind: input, shape index: {}]   ;;  %s3535_s1 = inlined_call_operand.vmem [shape: bf16[80,128], index: 1, kind: input, shape index: {}]   ;;  %s3536_s2 = inlined_call_operand.vmem [shape: f32[1,128], index: 2, kind: input, shape index: {}]   ;;  %s3537_s3 = inlined_call_operand.vmem [shape: bf16[416,128], index: 3, kind: output, shape index: {}]  }
   0x1   :  { %s2853_s14 = smov 0  }
   0x2 LB: > { %s2071_s15 = sadd.s32 4294967295, %s2825_s14   ;;  %s2866_s16 = sadd.s32 1, %s2825_s14   ;;  %s2825_s14 = sphi %s2853_s14, %s3577_s14   ;;  %s2821_s13 = sphi %s2851_s13, %s3576_s13   ;;  %s2817_s12 = sphi %s2849_s12, %s3575_s12  }
   0x3   : > { %s17_s17 = ssub.s32 %s2825_s14, %s2866_s16  ;;  %s20_s18 = sadd.s32 1, %s2821_s13 }
   0x4   : > { %p18_p0 = scmp.eq.s32.totalorder %s17_s17, 0  ;;  %p27_p1 = scmp.ne.s32.totalorder %s2821_s13, %s2817_s12 }
   0x5   : > { %p28_p2 = scmp.eq.s32.totalorder %s2825_s14, 0  ;;  %p2074_p4 = scmp.ge.s32.totalorder %s2825_s14, 2 }
   0x6   : > { %s2875_s19 = scalar_select %p18_p0, %s2821_s13, %s20_s18  }
   0x7   : > { %p29_p3 = por %p28_p2, %p27_p1  ;;  %127 = sbr.rel (%p2074_p4) target bundleno = 43 (0x2b), region = 24 }
   0xc   : > { %130 = sbr.rel (!%p29_p3) target bundleno = 43 (0x2b), region = 28  ;;  %s132_s20 = sand.u32 (%p29_p3), 1, %s2821_s13  }
   0xd   : > { %s2294_s21 = smul.u32 (%p29_p3), 104, %s2825_s14 }
   0xe   : > { %s2718_s22 = smul.u32 (%p29_p3), 416, %s132_s20 }
   0xf   : > { %s2883_s25 = scalar_lea.vmem (%p29_p3), %s3534_s0, %s2294_s21 }
  0x10   : > { %v154_v0 = vld [vmem:[%s2883_s25] sm:$0xff] (%p29_p3)   ;;  %v158_v1 = vld [vmem:[%s2883_s25 + $0x8] sm:$0xff] (%p29_p3)   ;;  %v162_v2 = vld [vmem:[%s2883_s25 + $0x10] sm:$0xff] (%p29_p3)   ;;  %s2888_s26 = scalar_lea.vmem (%p29_p3), [#allocation2], %s2718_s22 }
  0x11   : > { %155 = vst [vmem:[%s2888_s26] sm:$0xff] %v154_v0   ;;  %159 = vst [vmem:[%s2888_s26 + $0x8] sm:$0xff] %v158_v1   ;;  %v166_v3 = vld [vmem:[%s2883_s25 + $0x18] sm:$0xff]   ;;  %v170_v4 = vld [vmem:[%s2883_s25 + $0x20] sm:$0xff]  }
  0x12   : > { %163 = vst [vmem:[%s2888_s26 + $0x10] sm:$0xff] %v162_v2   ;;  %v174_v5 = vld [vmem:[%s2883_s25 + $0x28] sm:$0xff]   ;;  %167 = vst [vmem:[%s2888_s26 + $0x18] sm:$0xff] %v166_v3   ;;  %v178_v6 = vld [vmem:[%s2883_s25 + $0x30] sm:$0xff]  }
  0x13   : > { %171 = vst [vmem:[%s2888_s26 + $0x20] sm:$0xff] %v170_v4   ;;  %175 = vst [vmem:[%s2888_s26 + $0x28] sm:$0xff] %v174_v5   ;;  %v182_v7 = vld [vmem:[%s2883_s25 + $0x38] sm:$0xff]   ;;  %v186_v8 = vld [vmem:[%s2883_s25 + $0x40] sm:$0xff]  }
  0x14   : > { %179 = vst [vmem:[%s2888_s26 + $0x30] sm:$0xff] %v178_v6   ;;  %183 = vst [vmem:[%s2888_s26 + $0x38] sm:$0xff] %v182_v7   ;;  %v190_v9 = vld [vmem:[%s2883_s25 + $0x48] sm:$0xff]   ;;  %v194_v10 = vld [vmem:[%s2883_s25 + $0x50] sm:$0xff]  }
  0x15   : > { %187 = vst [vmem:[%s2888_s26 + $0x40] sm:$0xff] %v186_v8   ;;  %v198_v11 = vld [vmem:[%s2883_s25 + $0x58] sm:$0xff]   ;;  %191 = vst [vmem:[%s2888_s26 + $0x48] sm:$0xff] %v190_v9   ;;  %v202_v12 = vld [vmem:[%s2883_s25 + $0x60] sm:$0xff]  }
  0x16   : > { %195 = vst [vmem:[%s2888_s26 + $0x50] sm:$0xff] %v194_v10   ;;  %199 = vst [vmem:[%s2888_s26 + $0x58] sm:$0xff] %v198_v11   ;;  %v206_v13 = vld [vmem:[%s2883_s25 + $0xd0] sm:$0xff]   ;;  %v210_v14 = vld [vmem:[%s2883_s25 + $0xd8] sm:$0xff]  }
  0x17   : > { %203 = vst [vmem:[%s2888_s26 + $0x60] sm:$0xff] %v202_v12   ;;  %207 = vst [vmem:[%s2888_s26 + $0x68] sm:$0xff] %v206_v13   ;;  %v214_v15 = vld [vmem:[%s2883_s25 + $0xe0] sm:$0xff]   ;;  %v218_v16 = vld [vmem:[%s2883_s25 + $0xe8] sm:$0xff]  }
  0x18   : > { %211 = vst [vmem:[%s2888_s26 + $0x70] sm:$0xff] %v210_v14   ;;  %v222_v17 = vld [vmem:[%s2883_s25 + $0xf0] sm:$0xff]   ;;  %215 = vst [vmem:[%s2888_s26 + $0x78] sm:$0xff] %v214_v15   ;;  %v226_v18 = vld [vmem:[%s2883_s25 + $0xf8] sm:$0xff]  }
  0x19   : > { %219 = vst [vmem:[%s2888_s26 + $0x80] sm:$0xff] %v218_v16   ;;  %223 = vst [vmem:[%s2888_s26 + $0x88] sm:$0xff] %v222_v17   ;;  %v230_v19 = vld [vmem:[%s2883_s25 + $0x100] sm:$0xff]   ;;  %v234_v20 = vld [vmem:[%s2883_s25 + $0x108] sm:$0xff]  }
  0x1a   : > { %227 = vst [vmem:[%s2888_s26 + $0x90] sm:$0xff] %v226_v18   ;;  %231 = vst [vmem:[%s2888_s26 + $0x98] sm:$0xff] %v230_v19   ;;  %v238_v21 = vld [vmem:[%s2883_s25 + $0x110] sm:$0xff]   ;;  %v242_v22 = vld [vmem:[%s2883_s25 + $0x118] sm:$0xff]  }
  0x1b   : > { %235 = vst [vmem:[%s2888_s26 + $0xa0] sm:$0xff] %v234_v20   ;;  %v246_v23 = vld [vmem:[%s2883_s25 + $0x120] sm:$0xff]   ;;  %239 = vst [vmem:[%s2888_s26 + $0xa8] sm:$0xff] %v238_v21   ;;  %v250_v24 = vld [vmem:[%s2883_s25 + $0x128] sm:$0xff]  }
  0x1c   : > { %243 = vst [vmem:[%s2888_s26 + $0xb0] sm:$0xff] %v242_v22   ;;  %247 = vst [vmem:[%s2888_s26 + $0xb8] sm:$0xff] %v246_v23   ;;  %v254_v25 = vld [vmem:[%s2883_s25 + $0x130] sm:$0xff]   ;;  %v258_v26 = vld [vmem:[%s2883_s25 + $0x1a0] sm:$0xff]  }
  0x1d   : > { %251 = vst [vmem:[%s2888_s26 + $0xc0] sm:$0xff] %v250_v24   ;;  %255 = vst [vmem:[%s2888_s26 + $0xc8] sm:$0xff] %v254_v25   ;;  %v262_v27 = vld [vmem:[%s2883_s25 + $0x1a8] sm:$0xff]   ;;  %v266_v28 = vld [vmem:[%s2883_s25 + $0x1b0] sm:$0xff]  }
  0x1e   : > { %259 = vst [vmem:[%s2888_s26 + $0xd0] sm:$0xff] %v258_v26   ;;  %v270_v29 = vld [vmem:[%s2883_s25 + $0x1b8] sm:$0xff]   ;;  %263 = vst [vmem:[%s2888_s26 + $0xd8] sm:$0xff] %v262_v27   ;;  %v274_v30 = vld [vmem:[%s2883_s25 + $0x1c0] sm:$0xff]  }
  0x1f   : > { %267 = vst [vmem:[%s2888_s26 + $0xe0] sm:$0xff] %v266_v28   ;;  %271 = vst [vmem:[%s2888_s26 + $0xe8] sm:$0xff] %v270_v29   ;;  %v278_v31 = vld [vmem:[%s2883_s25 + $0x1c8] sm:$0xff]   ;;  %v282_v32 = vld [vmem:[%s2883_s25 + $0x1d0] sm:$0xff]  }
  0x20   : > { %275 = vst [vmem:[%s2888_s26 + $0xf0] sm:$0xff] %v274_v30   ;;  %279 = vst [vmem:[%s2888_s26 + $0xf8] sm:$0xff] %v278_v31   ;;  %v286_v33 = vld [vmem:[%s2883_s25 + $0x1d8] sm:$0xff]   ;;  %v290_v34 = vld [vmem:[%s2883_s25 + $0x1e0] sm:$0xff]  }
  0x21   : > { %283 = vst [vmem:[%s2888_s26 + $0x100] sm:$0xff] %v282_v32   ;;  %v294_v35 = vld [vmem:[%s2883_s25 + $0x1e8] sm:$0xff]   ;;  %287 = vst [vmem:[%s2888_s26 + $0x108] sm:$0xff] %v286_v33   ;;  %v298_v36 = vld [vmem:[%s2883_s25 + $0x1f0] sm:$0xff]  }
  0x22   : > { %291 = vst [vmem:[%s2888_s26 + $0x110] sm:$0xff] %v290_v34   ;;  %295 = vst [vmem:[%s2888_s26 + $0x118] sm:$0xff] %v294_v35   ;;  %v302_v37 = vld [vmem:[%s2883_s25 + $0x1f8] sm:$0xff]   ;;  %v306_v38 = vld [vmem:[%s2883_s25 + $0x200] sm:$0xff]  }
  0x23   : > { %299 = vst [vmem:[%s2888_s26 + $0x120] sm:$0xff] %v298_v36   ;;  %303 = vst [vmem:[%s2888_s26 + $0x128] sm:$0xff] %v302_v37   ;;  %v310_v39 = vld [vmem:[%s2883_s25 + $0x270] sm:$0xff]   ;;  %v314_v40 = vld [vmem:[%s2883_s25 + $0x278] sm:$0xff]  }
  0x24   : > { %307 = vst [vmem:[%s2888_s26 + $0x130] sm:$0xff] %v306_v38   ;;  %v318_v41 = vld [vmem:[%s2883_s25 + $0x280] sm:$0xff]   ;;  %311 = vst [vmem:[%s2888_s26 + $0x138] sm:$0xff] %v310_v39   ;;  %v322_v42 = vld [vmem:[%s2883_s25 + $0x288] sm:$0xff]  }
  0x25   : > { %315 = vst [vmem:[%s2888_s26 + $0x140] sm:$0xff] %v314_v40   ;;  %319 = vst [vmem:[%s2888_s26 + $0x148] sm:$0xff] %v318_v41   ;;  %v326_v43 = vld [vmem:[%s2883_s25 + $0x290] sm:$0xff]   ;;  %v330_v44 = vld [vmem:[%s2883_s25 + $0x298] sm:$0xff]  }
  0x26   : > { %323 = vst [vmem:[%s2888_s26 + $0x150] sm:$0xff] %v322_v42   ;;  %327 = vst [vmem:[%s2888_s26 + $0x158] sm:$0xff] %v326_v43   ;;  %v334_v45 = vld [vmem:[%s2883_s25 + $0x2a0] sm:$0xff]   ;;  %v338_v46 = vld [vmem:[%s2883_s25 + $0x2a8] sm:$0xff]  }
  0x27   : > { %331 = vst [vmem:[%s2888_s26 + $0x160] sm:$0xff] %v330_v44   ;;  %v342_v47 = vld [vmem:[%s2883_s25 + $0x2b0] sm:$0xff]   ;;  %335 = vst [vmem:[%s2888_s26 + $0x168] sm:$0xff] %v334_v45   ;;  %v346_v48 = vld [vmem:[%s2883_s25 + $0x2b8] sm:$0xff]  }
  0x28   : > { %339 = vst [vmem:[%s2888_s26 + $0x170] sm:$0xff] %v338_v46   ;;  %343 = vst [vmem:[%s2888_s26 + $0x178] sm:$0xff] %v342_v47   ;;  %v350_v49 = vld [vmem:[%s2883_s25 + $0x2c0] sm:$0xff]   ;;  %v354_v50 = vld [vmem:[%s2883_s25 + $0x2c8] sm:$0xff]  }
  0x29   : > { %347 = vst [vmem:[%s2888_s26 + $0x180] sm:$0xff] %v346_v48   ;;  %351 = vst [vmem:[%s2888_s26 + $0x188] sm:$0xff] %v350_v49   ;;  %v358_v51 = vld [vmem:[%s2883_s25 + $0x2d0] sm:$0xff]  }
  0x2a   : > { %355 = vst [vmem:[%s2888_s26 + $0x190] sm:$0xff] %v354_v50   ;;  %359 = vst [vmem:[%s2888_s26 + $0x198] sm:$0xff] %v358_v51  }
  0x2b PF: > { %p2076_p5 = scmp.ge.s32.totalorder %s2825_s14, 1  ;;  %p592_p6 = scmp.lt.s32.totalorder %s2825_s14, 3 }
  0x2d   : > { %p593_p7 = pnand %p2076_p5, %p592_p6 }
  0x2f   : > { %596 = sbr.rel (%p593_p7) target bundleno = 481 (0x1e1), region = 69 }
  0x34   : > { %v2746_v52 = vld [vmem:[%s3535_s1 + $0x20] sm:$0xff]   ;;  %v2827_v53 = vmov 0.0   ;;  %v2747_v54 = vld [vmem:[%s3535_s1 + $0x18] sm:$0xff]   ;;  %s599_s4 = sand.u32 1, %s2817_s12   ;;  %vm2828_vm0 = vmmov 0   ;;  %v2748_v55 = vld [vmem:[%s3535_s1 + $0x10] sm:$0xff]  }
  0x35   : > { %2470 = vmatprep.subr.bf16.mxu0 %v2827_v53  ;;  %2532 = vmatprep.subr.bf16.mxu1 %v2827_v53  ;;  %s2719_s5 = smul.u32 416, %s599_s4  ;;  %v2749_v56 = vld [vmem:[%s3535_s1 + $0x8] sm:$0xff]   ;;  %v2750_v57 = vld [vmem:[%s3535_s1] sm:$0xff]   ;;  %vm761_vm1 = vcmask 654336  }
  0x36   : > { %2471 = vmatpush3.bf16.msra.mxu0 %v2746_v52  ;;  %2533 = vmatpush3.bf16.msra.mxu1 %v2746_v52  ;;  %s623_s17 = smul.u32 26, %s2071_s15 }
  0x37   : > { %2472 = vmatprep.subr.bf16.mxu0 %v2827_v53  ;;  %2534 = vmatprep.subr.bf16.mxu1 %v2827_v53  ;;  %s3011_s8 = scalar_lea.vmem [#allocation2], %s2719_s5 }
  0x38   : > { %2480 = vmatprep.mubr.msk.bf16.mxu0 %vm2828_vm0, %v2827_v53  ;;  %2542 = vmatprep.mubr.msk.bf16.mxu1 %vm2828_vm0, %v2827_v53  ;;  %v2751_v58 = vld [vmem:[%s3011_s8] sm:$0xff]   ;;  %v2752_v59 = vld [vmem:[%s3011_s8 + $0x68] sm:$0xff]   ;;  %v2754_v61 = vld [vmem:[%s3011_s8 + $0x70] sm:$0xff]   ;;  %p624_p8 = scmp.lt.s32.totalorder %s623_s17, 51 }
  0x39   : > { %v2753_v60 = vld [vmem:[%s3011_s8 + $0x8] sm:$0xff]   ;;  %v2755_v62 = vld [vmem:[%s3011_s8 + $0x10] sm:$0xff]   ;;  %v2756_v63 = vld [vmem:[%s3011_s8 + $0x78] sm:$0xff]  }
  0x3a   : > { %2473 = vmatpush3.bf16.msra.mxu0 %v2747_v54  ;;  %2535 = vmatpush3.bf16.msra.mxu1 %v2747_v54  ;;  %v2757_v0 = vld [vmem:[%s3011_s8 + $0x18] sm:$0xff]   ;;  %v2758_v1 = vld [vmem:[%s3011_s8 + $0x80] sm:$0xff]   ;;  %v2760_v3 = vld [vmem:[%s3011_s8 + $0x88] sm:$0xff]   ;;  %s3579_s17 = smov (!%p624_p8, %s623_s17), 51 }
  0x3b   : > { %2474 = vmatprep.subr.bf16.mxu0 %v2827_v53  ;;  %2536 = vmatprep.subr.bf16.mxu1 %v2827_v53  ;;  %v2759_v2 = vld [vmem:[%s3011_s8 + $0x20] sm:$0xff]   ;;  %v2761_v4 = vld [vmem:[%s3011_s8 + $0x28] sm:$0xff]   ;;  %v2762_v5 = vld [vmem:[%s3011_s8 + $0x90] sm:$0xff]   ;;  %s2077_s14 = sshll.u32 %s3579_s17, 2 }
  0x3c   : > { %v2763_v6 = vld [vmem:[%s3011_s8 + $0x30] sm:$0xff]   ;;  %v2764_v7 = vld [vmem:[%s3011_s8 + $0x98] sm:$0xff]   ;;  %v2766_v9 = vld [vmem:[%s3011_s8 + $0xa0] sm:$0xff]   ;;  %s3416_s22 = scalar_lea.vmem %s3537_s3, %s2077_s14 }
  0x3d   : > { %v2765_v8 = vld [vmem:[%s3011_s8 + $0x38] sm:$0xff]   ;;  %v2767_v10 = vld [vmem:[%s3011_s8 + $0x40] sm:$0xff]   ;;  %v2768_v11 = vld [vmem:[%s3011_s8 + $0xa8] sm:$0xff]  }
  0x3e   : > { %2475 = vmatpush3.bf16.msra.mxu0 %v2748_v55  ;;  %2537 = vmatpush3.bf16.msra.mxu1 %v2748_v55  ;;  %v2769_v12 = vld [vmem:[%s3011_s8 + $0x48] sm:$0xff]   ;;  %v2770_v13 = vld [vmem:[%s3011_s8 + $0xb0] sm:$0xff]   ;;  %v2772_v15 = vld [vmem:[%s3011_s8 + $0xb8] sm:$0xff]  }
  0x3f   : > { %2476 = vmatprep.subr.bf16.mxu0 %v2827_v53  ;;  %2538 = vmatprep.subr.bf16.mxu1 %v2827_v53  ;;  %v2771_v14 = vld [vmem:[%s3011_s8 + $0x50] sm:$0xff]   ;;  %v2773_v16 = vld [vmem:[%s3011_s8 + $0x58] sm:$0xff]   ;;  %v2774_v17 = vld [vmem:[%s3011_s8 + $0xc0] sm:$0xff]  }
  0x40   : > { %v2775_v18 = vld [vmem:[%s3011_s8 + $0x60] sm:$0xff]   ;;  %v2776_v19 = vld [vmem:[%s3011_s8 + $0xc8] sm:$0xff]   ;;  %v2777_v20 = vld [vmem:[%s3011_s8 + $0xd0] sm:$0xff]  }
  0x41   : > { %v2778_v21 = vld [vmem:[%s3011_s8 + $0x138] sm:$0xff]   ;;  %v2780_v23 = vld [vmem:[%s3011_s8 + $0x140] sm:$0xff]   ;;  %v2782_v25 = vld [vmem:[%s3011_s8 + $0x148] sm:$0xff]  }
  0x42   : > { %2477 = vmatpush3.bf16.msra.mxu0 %v2749_v56  ;;  %2539 = vmatpush3.bf16.msra.mxu1 %v2749_v56  ;;  %v2779_v22 = vld [vmem:[%s3011_s8 + $0xd8] sm:$0xff]   ;;  %v2781_v24 = vld [vmem:[%s3011_s8 + $0xe0] sm:$0xff]   ;;  %v2783_v26 = vld [vmem:[%s3011_s8 + $0xe8] sm:$0xff]  }
  0x43   : > { %2478 = vmatprep.subr.bf16.mxu0 %v2827_v53  ;;  %2540 = vmatprep.subr.bf16.mxu1 %v2827_v53  ;;  %v2784_v27 = vld [vmem:[%s3011_s8 + $0x150] sm:$0xff]   ;;  %v2786_v29 = vld [vmem:[%s3011_s8 + $0x158] sm:$0xff]   ;;  %v2788_v31 = vld [vmem:[%s3011_s8 + $0x160] sm:$0xff]  }
  0x44   : > { %v2785_v28 = vld [vmem:[%s3011_s8 + $0xf0] sm:$0xff]   ;;  %v2787_v30 = vld [vmem:[%s3011_s8 + $0xf8] sm:$0xff]   ;;  %v2789_v32 = vld [vmem:[%s3011_s8 + $0x100] sm:$0xff]  }
  0x45   : > { %v2790_v33 = vld [vmem:[%s3011_s8 + $0x168] sm:$0xff]   ;;  %v2792_v35 = vld [vmem:[%s3011_s8 + $0x170] sm:$0xff]   ;;  %v2794_v37 = vld [vmem:[%s3011_s8 + $0x178] sm:$0xff]  }
  0x46   : > { %2479 = vmatpush3.bf16.msra.mxu0 %v2750_v57  ;;  %2541 = vmatpush3.bf16.msra.mxu1 %v2750_v57  ;;  %v2791_v34 = vld [vmem:[%s3011_s8 + $0x108] sm:$0xff]   ;;  %v2793_v36 = vld [vmem:[%s3011_s8 + $0x110] sm:$0xff]   ;;  %v2795_v38 = vld [vmem:[%s3011_s8 + $0x118] sm:$0xff]  }
  0x47   : > { %2594 = vmatprep.subr.bf16.mxu0 %v2827_v53  ;;  %2656 = vmatprep.subr.bf16.mxu1 %v2827_v53  ;;  %v2796_v39 = vld [vmem:[%s3011_s8 + $0x180] sm:$0xff]   ;;  %v2798_v41 = vld [vmem:[%s3011_s8 + $0x188] sm:$0xff]   ;;  %v2800_v43 = vld [vmem:[%s3011_s8 + $0x190] sm:$0xff]  }
  0x48   : > { %v2797_v40 = vld [vmem:[%s3011_s8 + $0x120] sm:$0xff]   ;;  %v2799_v42 = vld [vmem:[%s3011_s8 + $0x128] sm:$0xff]   ;;  %v2801_v51 = vld [vmem:[%s3011_s8 + $0x130] sm:$0xff]  }
  0x49   : > { %2481 = vmatmul.mubr.msk.bf16.vlgmr.msra.gmra.mxu0 %vm761_vm1, %v2751_v58  ;;  %2543 = vmatmul.mubr.msk.bf16.vlgmr.msra.gmra.mxu1 %vm761_vm1, %v2752_v59 }
  0x4a   : > { %2595 = vmatpush3.bf16.msra.mxu0 %v2746_v52  ;;  %2657 = vmatpush3.bf16.msra.mxu1 %v2746_v52  ;;  %v2802_v52 = vld [vmem:[%s3011_s8 + $0x198] sm:$0xff]  }
  0x4b   : > { %2484 = vmatprep.mubr.msk.bf16.mxu0 %vm2828_vm0, %v2827_v53  ;;  %2546 = vmatprep.mubr.msk.bf16.mxu1 %vm2828_vm0, %v2827_v53 }
  0x4c   : > { %2596 = vmatprep.subr.bf16.mxu0 %v2827_v53  ;;  %2658 = vmatprep.subr.bf16.mxu1 %v2827_v53 }
  0x4e   : > { %2597 = vmatpush3.bf16.msra.mxu0 %v2747_v54  ;;  %2659 = vmatpush3.bf16.msra.mxu1 %v2747_v54 }
  0x4f   : > { %2598 = vmatprep.subr.bf16.mxu0 %v2827_v53  ;;  %2660 = vmatprep.subr.bf16.mxu1 %v2827_v53 }
  0x51   : > { %2485 = vmatmul.mubr.msk.bf16.gmra.mxu0 %vm761_vm1, %v2753_v60  ;;  %2547 = vmatmul.mubr.msk.bf16.gmra.mxu1 %vm761_vm1, %v2754_v61 }
  0x52   : > { %2488 = vmatprep.mubr.msk.bf16.mxu0 %vm2828_vm0, %v2827_v53  ;;  %2550 = vmatprep.mubr.msk.bf16.mxu1 %vm2828_vm0, %v2827_v53 }
  0x53   : > { %2599 = vmatpush3.bf16.msra.mxu0 %v2748_v55  ;;  %2661 = vmatpush3.bf16.msra.mxu1 %v2748_v55 }
  0x54   : > { %2600 = vmatprep.subr.bf16.mxu0 %v2827_v53  ;;  %2662 = vmatprep.subr.bf16.mxu1 %v2827_v53 }
  0x57   : > { %2601 = vmatpush3.bf16.msra.mxu0 %v2749_v56  ;;  %2663 = vmatpush3.bf16.msra.mxu1 %v2749_v56 }
  0x58   : > { %2602 = vmatprep.subr.bf16.mxu0 %v2827_v53  ;;  %2664 = vmatprep.subr.bf16.mxu1 %v2827_v53 }
  0x59   : > { %2489 = vmatmul.mubr.msk.bf16.gmra.mxu0 %vm761_vm1, %v2755_v62  ;;  %2551 = vmatmul.mubr.msk.bf16.gmra.mxu1 %vm761_vm1, %v2756_v63 }
  0x5a   : > { %2492 = vmatprep.mubr.msk.bf16.mxu0 %vm2828_vm0, %v2827_v53  ;;  %2554 = vmatprep.mubr.msk.bf16.mxu1 %vm2828_vm0, %v2827_v53 }
  0x5b   : > { %2603 = vmatpush3.bf16.msra.mxu0 %v2750_v57  ;;  %2665 = vmatpush3.bf16.msra.mxu1 %v2750_v57 }
  0x61   : > { %2493 = vmatmul.mubr.msk.bf16.gmra.mxu0 %vm761_vm1, %v2757_v0  ;;  %2555 = vmatmul.mubr.msk.bf16.gmra.mxu1 %vm761_vm1, %v2758_v1 }
  0x62   : > { %2496 = vmatprep.mubr.msk.bf16.mxu0 %vm2828_vm0, %v2827_v53  ;;  %2558 = vmatprep.mubr.msk.bf16.mxu1 %vm2828_vm0, %v2827_v53 }
  0x69   : > { %2497 = vmatmul.mubr.msk.bf16.gmra.mxu0 %vm761_vm1, %v2759_v2  ;;  %2559 = vmatmul.mubr.msk.bf16.gmra.mxu1 %vm761_vm1, %v2760_v3 }
  0x6a   : > { %2500 = vmatprep.mubr.msk.bf16.mxu0 %vm2828_vm0, %v2827_v53  ;;  %2562 = vmatprep.mubr.msk.bf16.mxu1 %vm2828_vm0, %v2827_v53 }
  0x71   : > { %2501 = vmatmul.mubr.msk.bf16.gmra.mxu0 %vm761_vm1, %v2761_v4  ;;  %2563 = vmatmul.mubr.msk.bf16.gmra.mxu1 %vm761_vm1, %v2762_v5 }
  0x72   : > { %2504 = vmatprep.mubr.msk.bf16.mxu0 %vm2828_vm0, %v2827_v53  ;;  %2566 = vmatprep.mubr.msk.bf16.mxu1 %vm2828_vm0, %v2827_v53 }
  0x79   : > { %2505 = vmatmul.mubr.msk.bf16.gmra.mxu0 %vm761_vm1, %v2763_v6  ;;  %2567 = vmatmul.mubr.msk.bf16.gmra.mxu1 %vm761_vm1, %v2764_v7 }
  0x7a   : > { %2508 = vmatprep.mubr.msk.bf16.mxu0 %vm2828_vm0, %v2827_v53  ;;  %2570 = vmatprep.mubr.msk.bf16.mxu1 %vm2828_vm0, %v2827_v53 }
  0x81   : > { %2509 = vmatmul.mubr.msk.bf16.gmra.mxu0 %vm761_vm1, %v2765_v8  ;;  %2571 = vmatmul.mubr.msk.bf16.gmra.mxu1 %vm761_vm1, %v2766_v9 }
  0x82   : > { %2512 = vmatprep.mubr.msk.bf16.mxu0 %vm2828_vm0, %v2827_v53  ;;  %2574 = vmatprep.mubr.msk.bf16.mxu1 %vm2828_vm0, %v2827_v53 }
  0x89   : > { %2513 = vmatmul.mubr.msk.bf16.gmra.mxu0 %vm761_vm1, %v2767_v10  ;;  %2575 = vmatmul.mubr.msk.bf16.gmra.mxu1 %vm761_vm1, %v2768_v11 }
  0x8a   : > { %2516 = vmatprep.mubr.msk.bf16.mxu0 %vm2828_vm0, %v2827_v53  ;;  %2578 = vmatprep.mubr.msk.bf16.mxu1 %vm2828_vm0, %v2827_v53 }
  0x91   : > { %2517 = vmatmul.mubr.msk.bf16.gmra.mxu0 %vm761_vm1, %v2769_v12  ;;  %2579 = vmatmul.mubr.msk.bf16.gmra.mxu1 %vm761_vm1, %v2770_v13 }
  0x92   : > { %2520 = vmatprep.mubr.msk.bf16.mxu0 %vm2828_vm0, %v2827_v53  ;;  %2582 = vmatprep.mubr.msk.bf16.mxu1 %vm2828_vm0, %v2827_v53 }
  0x99   : > { %2521 = vmatmul.mubr.msk.bf16.gmra.mxu0 %vm761_vm1, %v2771_v14  ;;  %2583 = vmatmul.mubr.msk.bf16.gmra.mxu1 %vm761_vm1, %v2772_v15 }
  0x9a   : > { %2524 = vmatprep.mubr.msk.bf16.mxu0 %vm2828_vm0, %v2827_v53  ;;  %2586 = vmatprep.mubr.msk.bf16.mxu1 %vm2828_vm0, %v2827_v53 }
  0xa1   : > { %2525 = vmatmul.mubr.msk.bf16.gmra.mxu0 %vm761_vm1, %v2773_v16  ;;  %2587 = vmatmul.mubr.msk.bf16.gmra.mxu1 %vm761_vm1, %v2774_v17 }
  0xa2   : > { %2528 = vmatprep.mubr.msk.bf16.mxu0 %vm2828_vm0, %v2827_v53  ;;  %2590 = vmatprep.mubr.msk.bf16.mxu1 %vm2828_vm0, %v2827_v53 }
  0xa9   : > { %2529 = vmatmul.mubr.msk.bf16.gmra.mxu0 %vm761_vm1, %v2775_v18  ;;  %2591 = vmatmul.mubr.msk.bf16.gmra.mxu1 %vm761_vm1, %v2776_v19 }
  0xaa   : > { %2604 = vmatprep.mubr.msk.bf16.mxu0 %vm2828_vm0, %v2827_v53  ;;  %2666 = vmatprep.mubr.msk.bf16.mxu1 %vm2828_vm0, %v2827_v53 }
  0xb1   : > { %2605 = vmatmul.mubr.msk.bf16.vlgmr.msra.gmra.mxu0 %vm761_vm1, %v2777_v20  ;;  %2667 = vmatmul.mubr.msk.bf16.vlgmr.msra.gmra.mxu1 %vm761_vm1, %v2778_v21 }
  0xb2   : > { %2608 = vmatprep.mubr.msk.bf16.mxu0 %vm2828_vm0, %v2827_v53  ;;  %2670 = vmatprep.mubr.msk.bf16.mxu1 %vm2828_vm0, %v2827_v53 }
  0xb9   : > { %2609 = vmatmul.mubr.msk.bf16.gmra.mxu0 %vm761_vm1, %v2779_v22  ;;  %2671 = vmatmul.mubr.msk.bf16.gmra.mxu1 %vm761_vm1, %v2780_v23 }
  0xba   : > { %2612 = vmatprep.mubr.msk.bf16.mxu0 %vm2828_vm0, %v2827_v53  ;;  %2674 = vmatprep.mubr.msk.bf16.mxu1 %vm2828_vm0, %v2827_v53 }
  0xc1   : > { %2613 = vmatmul.mubr.msk.bf16.gmra.mxu0 %vm761_vm1, %v2781_v24  ;;  %2675 = vmatmul.mubr.msk.bf16.gmra.mxu1 %vm761_vm1, %v2782_v25 }
  0xc2   : > { %2616 = vmatprep.mubr.msk.bf16.mxu0 %vm2828_vm0, %v2827_v53  ;;  %2678 = vmatprep.mubr.msk.bf16.mxu1 %vm2828_vm0, %v2827_v53 }
  0xc9   : > { %2617 = vmatmul.mubr.msk.bf16.gmra.mxu0 %vm761_vm1, %v2783_v26  ;;  %2679 = vmatmul.mubr.msk.bf16.gmra.mxu1 %vm761_vm1, %v2784_v27 }
  0xca   : > { %2620 = vmatprep.mubr.msk.bf16.mxu0 %vm2828_vm0, %v2827_v53  ;;  %2682 = vmatprep.mubr.msk.bf16.mxu1 %vm2828_vm0, %v2827_v53 }
  0xd1   : > { %2621 = vmatmul.mubr.msk.bf16.gmra.mxu0 %vm761_vm1, %v2785_v28  ;;  %2683 = vmatmul.mubr.msk.bf16.gmra.mxu1 %vm761_vm1, %v2786_v29 }
  0xd2   : > { %2624 = vmatprep.mubr.msk.bf16.mxu0 %vm2828_vm0, %v2827_v53  ;;  %2686 = vmatprep.mubr.msk.bf16.mxu1 %vm2828_vm0, %v2827_v53 }
  0xd9   : > { %2625 = vmatmul.mubr.msk.bf16.gmra.mxu0 %vm761_vm1, %v2787_v30  ;;  %2687 = vmatmul.mubr.msk.bf16.gmra.mxu1 %vm761_vm1, %v2788_v31 }
  0xda   : > { %2628 = vmatprep.mubr.msk.bf16.mxu0 %vm2828_vm0, %v2827_v53  ;;  %2690 = vmatprep.mubr.msk.bf16.mxu1 %vm2828_vm0, %v2827_v53 }
  0xe1   : > { %2629 = vmatmul.mubr.msk.bf16.gmra.mxu0 %vm761_vm1, %v2789_v32  ;;  %2691 = vmatmul.mubr.msk.bf16.gmra.mxu1 %vm761_vm1, %v2790_v33 }
  0xe2   : > { %2632 = vmatprep.mubr.msk.bf16.mxu0 %vm2828_vm0, %v2827_v53  ;;  %2694 = vmatprep.mubr.msk.bf16.mxu1 %vm2828_vm0, %v2827_v53 }
  0xe9   : > { %2633 = vmatmul.mubr.msk.bf16.gmra.mxu0 %vm761_vm1, %v2791_v34  ;;  %2695 = vmatmul.mubr.msk.bf16.gmra.mxu1 %vm761_vm1, %v2792_v35 }
  0xea   : > { %2636 = vmatprep.mubr.msk.bf16.mxu0 %vm2828_vm0, %v2827_v53  ;;  %2698 = vmatprep.mubr.msk.bf16.mxu1 %vm2828_vm0, %v2827_v53 }
  0xf1   : > { %2637 = vmatmul.mubr.msk.bf16.gmra.mxu0 %vm761_vm1, %v2793_v36  ;;  %2699 = vmatmul.mubr.msk.bf16.gmra.mxu1 %vm761_vm1, %v2794_v37 }
  0xf2   : > { %2640 = vmatprep.mubr.msk.bf16.mxu0 %vm2828_vm0, %v2827_v53  ;;  %2702 = vmatprep.mubr.msk.bf16.mxu1 %vm2828_vm0, %v2827_v53 }
  0xf9   : > { %2641 = vmatmul.mubr.msk.bf16.gmra.mxu0 %vm761_vm1, %v2795_v38  ;;  %2703 = vmatmul.mubr.msk.bf16.gmra.mxu1 %vm761_vm1, %v2796_v39 }
  0xfa   : > { %2644 = vmatprep.mubr.msk.bf16.mxu0 %vm2828_vm0, %v2827_v53  ;;  %2706 = vmatprep.mubr.msk.bf16.mxu1 %vm2828_vm0, %v2827_v53 }
 0x101   : > { %2645 = vmatmul.mubr.msk.bf16.gmra.mxu0 %vm761_vm1, %v2797_v40  ;;  %2707 = vmatmul.mubr.msk.bf16.gmra.mxu1 %vm761_vm1, %v2798_v41 }
 0x102   : > { %2648 = vmatprep.mubr.msk.bf16.mxu0 %vm2828_vm0, %v2827_v53  ;;  %2710 = vmatprep.mubr.msk.bf16.mxu1 %vm2828_vm0, %v2827_v53 }
 0x109   : > { %v3229_v44 = vpop.f32.mrf.mxu0  ;;  %v3231_v45 = vpop.f32.mrf.mxu1  ;;  %2649 = vmatmul.mubr.msk.bf16.gmra.mxu0 %vm761_vm1, %v2799_v42  ;;  %2711 = vmatmul.mubr.msk.bf16.gmra.mxu1 %vm761_vm1, %v2800_v43 }
 0x10a   : > { %v1206_v46 = vmax.f32 %v3229_v44, %v3231_v45  ;;  %2652 = vmatprep.mubr.msk.bf16.mxu0 %vm2828_vm0, %v2827_v53  ;;  %2714 = vmatprep.mubr.msk.bf16.mxu1 %vm2828_vm0, %v2827_v53  ;;  %v3403_v53 = vld [vmem:[%s3536_s2] ss:$0 sm:$0xff] }
 0x10b   : > { %v2482_v47 = vpop.f32.mrf.mxu0  ;;  %v2544_v48 = vpop.f32.mrf.mxu1 }
 0x10d   : > { %v3241_v49 = vpop.f32.mrf.mxu0  ;;  %v3243_v50 = vpop.f32.mrf.mxu1 }
 0x10f   : > { %v2483_v55 = vpop.f32.mrf.mxu0  ;;  %v2545_v56 = vpop.f32.mrf.mxu1 }
 0x111   : > { %v3249_v57 = vpop.f32.mrf.mxu0  ;;  %v3251_v58 = vpop.f32.mrf.mxu1  ;;  %2653 = vmatmul.mubr.msk.bf16.gmra.mxu0 %vm761_vm1, %v2801_v51  ;;  %2715 = vmatmul.mubr.msk.bf16.gmra.mxu1 %vm761_vm1, %v2802_v52 }
 0x113   : > { %v2486_v59 = vpop.f32.mrf.mxu0  ;;  %v2548_v60 = vpop.f32.mrf.mxu1 }
 0x115   : > { %v3257_v61 = vpop.f32.mrf.mxu0  ;;  %v3259_v62 = vpop.f32.mrf.mxu1 }
 0x117   : > { %v2487_v0 = vpop.f32.mrf.mxu0  ;;  %v2549_v1 = vpop.f32.mrf.mxu1 }
 0x119   : > { %v3263_v2 = vpop.f32.mrf.mxu0  ;;  %v3265_v3 = vpop.f32.mrf.mxu1 }
 0x11b   : > { %v2490_v5 = vpop.f32.mrf.mxu0  ;;  %v2552_v6 = vpop.f32.mrf.mxu1 }
 0x11d   : > { %v3269_v7 = vpop.f32.mrf.mxu0  ;;  %v3271_v8 = vpop.f32.mrf.mxu1 }
 0x11f   : > { %v2491_v10 = vpop.f32.mrf.mxu0  ;;  %v2553_v11 = vpop.f32.mrf.mxu1 }
 0x121   : > { %v3275_v12 = vpop.f32.mrf.mxu0  ;;  %v3277_v13 = vpop.f32.mrf.mxu1 }
 0x123   : > { %v2494_v15 = vpop.f32.mrf.mxu0  ;;  %v2556_v16 = vpop.f32.mrf.mxu1 }
 0x125   : > { %v3281_v17 = vpop.f32.mrf.mxu0  ;;  %v3283_v18 = vpop.f32.mrf.mxu1 }
 0x127   : > { %v2495_v20 = vpop.f32.mrf.mxu0  ;;  %v2557_v21 = vpop.f32.mrf.mxu1 }
 0x129   : > { %v3287_v22 = vpop.f32.mrf.mxu0  ;;  %v3289_v23 = vpop.f32.mrf.mxu1 }
 0x12b   : > { %v2498_v25 = vpop.f32.mrf.mxu0  ;;  %v2560_v26 = vpop.f32.mrf.mxu1 }
 0x12d   : > { %v3293_v27 = vpop.f32.mrf.mxu0  ;;  %v3295_v28 = vpop.f32.mrf.mxu1 }
 0x12f   : > { %v2499_v30 = vpop.f32.mrf.mxu0  ;;  %v2561_v31 = vpop.f32.mrf.mxu1 }
 0x131   : > { %v3299_v32 = vpop.f32.mrf.mxu0  ;;  %v3301_v33 = vpop.f32.mrf.mxu1 }
 0x133   : > { %v2502_v35 = vpop.f32.mrf.mxu0  ;;  %v2564_v36 = vpop.f32.mrf.mxu1 }
 0x135   : > { %v3305_v37 = vpop.f32.mrf.mxu0  ;;  %v3307_v38 = vpop.f32.mrf.mxu1 }
 0x137   : > { %v2503_v40 = vpop.f32.mrf.mxu0  ;;  %v2565_v41 = vpop.f32.mrf.mxu1 }
 0x139   : > { %v3311_v42 = vpop.f32.mrf.mxu0  ;;  %v3313_v43 = vpop.f32.mrf.mxu1 }
 0x13b   : > { %v2506_v48 = vpop.f32.mrf.mxu0  ;;  %v2568_v51 = vpop.f32.mrf.mxu1 }
 0x13d   : > { %v3317_v52 = vpop.f32.mrf.mxu0  ;;  %v3319_v55 = vpop.f32.mrf.mxu1 }
 0x13f   : > { %v2507_v59 = vpop.f32.mrf.mxu0  ;;  %v2569_v60 = vpop.f32.mrf.mxu1 }
 0x141   : > { %v3323_v0 = vpop.f32.mrf.mxu0  ;;  %v3325_v1 = vpop.f32.mrf.mxu1 }
 0x143   : > { %v2510_v6 = vpop.f32.mrf.mxu0  ;;  %v2572_v10 = vpop.f32.mrf.mxu1 }
 0x145   : > { %v3329_v11 = vpop.f32.mrf.mxu0  ;;  %v3331_v15 = vpop.f32.mrf.mxu1 }
 0x147   : > { %v2511_v20 = vpop.f32.mrf.mxu0  ;;  %v2573_v21 = vpop.f32.mrf.mxu1 }
 0x149   : > { %v3335_v25 = vpop.f32.mrf.mxu0  ;;  %v3337_v26 = vpop.f32.mrf.mxu1 }
 0x14b   : > { %v2514_v31 = vpop.f32.mrf.mxu0  ;;  %v2576_v35 = vpop.f32.mrf.mxu1 }
 0x14d   : > { %v3341_v36 = vpop.f32.mrf.mxu0  ;;  %v3343_v40 = vpop.f32.mrf.mxu1 }
 0x14f   : > { %v2515_v48 = vpop.f32.mrf.mxu0  ;;  %v2577_v51 = vpop.f32.mrf.mxu1 }
 0x151   : > { %v3347_v59 = vpop.f32.mrf.mxu0  ;;  %v3349_v60 = vpop.f32.mrf.mxu1 }
 0x153   : > { %v2518_v10 = vpop.f32.mrf.mxu0  ;;  %v2580_v20 = vpop.f32.mrf.mxu1 }
 0x155   : > { %v3353_v21 = vpop.f32.mrf.mxu0  ;;  %v3355_v31 = vpop.f32.mrf.mxu1 }
 0x157   : > { %v2519_v30 = vpop.f32.mrf.mxu0  ;;  %v2581_v41 = vpop.f32.mrf.mxu1 }
 0x159   : > { %v3359_v48 = vpop.f32.mrf.mxu0  ;;  %v3361_v51 = vpop.f32.mrf.mxu1 }
 0x15b   : > { %v2522_v5 = vpop.f32.mrf.mxu0  ;;  %v2584_v6 = vpop.f32.mrf.mxu1 }
 0x15d   : > { %v3365_v10 = vpop.f32.mrf.mxu0  ;;  %v3367_v20 = vpop.f32.mrf.mxu1 }
 0x15f   : > { %v2523_v47 = vpop.f32.mrf.mxu0  ;;  %v2585_v35 = vpop.f32.mrf.mxu1 }
 0x161   : > { %v3371_v30 = vpop.f32.mrf.mxu0  ;;  %v3373_v41 = vpop.f32.mrf.mxu1 }
 0x163   : > { %v2526_v16 = vpop.f32.mrf.mxu0  ;;  %v2588_v5 = vpop.f32.mrf.mxu1 }
 0x165   : > { %v3377_v6 = vpop.f32.mrf.mxu0  ;;  %v3379_v34 = vpop.f32.mrf.mxu1 }
 0x167   : > { %v2527_v56 = vpop.f32.mrf.mxu0  ;;  %v2589_v47 = vpop.f32.mrf.mxu1 }
 0x169   : > { %v3383_v35 = vpop.f32.mrf.mxu0  ;;  %v3385_v24 = vpop.f32.mrf.mxu1 }
 0x16a   : > { %3542 = vst [vmem:[#allocation3_spill] sm:$0xff] %v3383_v35  ;;  %3543 = vst [vmem:[#allocation4_spill] sm:$0xff] %v3385_v24 }
 0x16b   : > { %v2530_v39 = vpop.f32.mrf.mxu0  ;;  %v2592_v14 = vpop.f32.mrf.mxu1 }
 0x16d   : > { %v3389_v16 = vpop.f32.mrf.mxu0  ;;  %v3391_v5 = vpop.f32.mrf.mxu1 }
 0x16e   : > { %3544 = vst [vmem:[#allocation5_spill] sm:$0xff] %v3389_v16  ;;  %3545 = vst [vmem:[#allocation6_spill] sm:$0xff] %v3391_v5 }
 0x16f   : > { %v2531_v56 = vpop.f32.mrf.mxu0  ;;  %v2593_v47 = vpop.f32.mrf.mxu1 }
 0x170   : > { %v3546_v56 = vmax.f32 %v3241_v49, %v3243_v50 }
 0x171   : > { %v1397_v29 = vpop.f32.mrf.mxu0  ;;  %v1691_v4 = vpop.f32.mrf.mxu1 }
 0x172   : > { %v1500_v63 = vmax.f32 %v1206_v46, %v1397_v29 }
 0x173   : > { %v2606_v39 = vpop.f32.mrf.mxu0  ;;  %v2668_v14 = vpop.f32.mrf.mxu1 }
 0x174   : > { %v1794_v19 = vmax.f32 %v1500_v63, %v1691_v4  ;;  %v3547_v4 = vmax.f32 %v3249_v57, %v3251_v58 }
 0x175   : > { %v1400_v9 = vpop.f32.mrf.mxu0  ;;  %v1694_v54 = vpop.f32.mrf.mxu1 }
 0x176   : > { %v1501_v47 = vmax.f32 %v3546_v56, %v1400_v9  ;;  %v1827_v44 = vadd.f32 %v3403_v53, %v1794_v19 }
 0x177   : > { %v2607_v5 = vpop.f32.mrf.mxu0  ;;  %v2669_v16 = vpop.f32.mrf.mxu1 }
 0x178   : > { %v1795_v45 = vmax.f32 %v1501_v47, %v1694_v54  ;;  %v1853_v35 = vmax.f32 %v1827_v44, 0.0  ;;  %v3548_v16 = vmax.f32 %v3257_v61, %v3259_v62 }
 0x179   : > { %v1405_v46 = vpop.f32.mrf.mxu0  ;;  %v1699_v29 = vpop.f32.mrf.mxu1 }
 0x17a   : > { %v1828_v63 = vadd.f32 %v3403_v53, %v1795_v45  ;;  %v1502_v39 = vmax.f32 %v3547_v4, %v1405_v46  ;;  %v3549_v46 = vmax.f32 %v3263_v2, %v3265_v3 }
 0x17b   : > { %v2610_v14 = vpop.f32.mrf.mxu0  ;;  %v2672_v24 = vpop.f32.mrf.mxu1 }
 0x17c   : > { %v1854_v49 = vmax.f32 %v1828_v63, 0.0  ;;  %v1796_v50 = vmax.f32 %v1502_v39, %v1699_v29 }
 0x17d   : > { %v1408_v54 = vpop.f32.mrf.mxu0  ;;  %v1702_v9 = vpop.f32.mrf.mxu1 }
 0x17e   : > { %v2324_v19 = vpack.c.bf16 %v1854_v49, %v1853_v35  ;;  %v1503_v5 = vmax.f32 %v3548_v16, %v1408_v54  ;;  %v1829_v24 = vadd.f32 %v3403_v53, %v1796_v50  ;;  %v3550_v50 = vmax.f32 %v3269_v7, %v3271_v8 }
 0x17f   : > { %v2611_v57 = vpop.f32.mrf.mxu0  ;;  %v2673_v58 = vpop.f32.mrf.mxu1 }
 0x180   : > { %2325 = vst [vmem:[%s3416_s22] sm:$0xff] %v2324_v19   ;;  %v1797_v56 = vmax.f32 %v1503_v5, %v1702_v9  ;;  %v1855_v4 = vmax.f32 %v1829_v24, 0.0  ;;  %v3551_v58 = vmax.f32 %v3275_v12, %v3277_v13 }
 0x181   : > { %v1413_v47 = vpop.f32.mrf.mxu0  ;;  %v1707_v44 = vpop.f32.mrf.mxu1 }
 0x182   : > { %v1830_v45 = vadd.f32 %v3403_v53, %v1797_v56  ;;  %v1504_v29 = vmax.f32 %v3549_v46, %v1413_v47 }
 0x183   : > { %v2614_v35 = vpop.f32.mrf.mxu0  ;;  %v2676_v63 = vpop.f32.mrf.mxu1 }
 0x184   : > { %v1856_v61 = vmax.f32 %v1830_v45, 0.0  ;;  %v1798_v62 = vmax.f32 %v1504_v29, %v1707_v44  ;;  %v3552_v35 = vmax.f32 %v3281_v17, %v3283_v18 }
 0x185   : > { %v1416_v39 = vpop.f32.mrf.mxu0  ;;  %v1710_v14 = vpop.f32.mrf.mxu1 }
 0x186   : > { %v2329_v49 = vpack.c.bf16 %v1856_v61, %v1855_v4  ;;  %v1505_v54 = vmax.f32 %v3550_v50, %v1416_v39  ;;  %v1831_v16 = vadd.f32 %v3403_v53, %v1798_v62 }
 0x187   : > { %v2615_v9 = vpop.f32.mrf.mxu0  ;;  %v2677_v19 = vpop.f32.mrf.mxu1 }
 0x188   : > { %2386 = vst [vmem:[%s3416_s22 + $0x8] sm:$0xff] %v2329_v49   ;;  %v1799_v5 = vmax.f32 %v1505_v54, %v1710_v14  ;;  %v1857_v44 = vmax.f32 %v1831_v16, 0.0  ;;  %v3553_v49 = vmax.f32 %v3287_v22, %v3289_v23 }
 0x189   : > { %v1421_v2 = vpop.f32.mrf.mxu0  ;;  %v1715_v3 = vpop.f32.mrf.mxu1 }
 0x18a   : > { %v1832_v57 = vadd.f32 %v3403_v53, %v1799_v5  ;;  %v1506_v24 = vmax.f32 %v3551_v58, %v1421_v2 }
 0x18b   : > { %v2618_v56 = vpop.f32.mrf.mxu0  ;;  %v2680_v47 = vpop.f32.mrf.mxu1 }
 0x18c   : > { %v1858_v7 = vmax.f32 %v1832_v57, 0.0  ;;  %v1800_v8 = vmax.f32 %v1506_v24, %v1715_v3  ;;  %v3554_v3 = vmax.f32 %v3293_v27, %v3295_v28 }
 0x18d   : > { %v1424_v45 = vpop.f32.mrf.mxu0  ;;  %v1718_v46 = vpop.f32.mrf.mxu1 }
 0x18e   : > { %v2334_v29 = vpack.c.bf16 %v1858_v7, %v1857_v44  ;;  %v1507_v63 = vmax.f32 %v3552_v35, %v1424_v45  ;;  %v1833_v62 = vadd.f32 %v3403_v53, %v1800_v8  ;;  %v3555_v7 = vmax.f32 %v3299_v32, %v3301_v33 }
 0x18f   : > { %v2619_v4 = vpop.f32.mrf.mxu0  ;;  %v2681_v61 = vpop.f32.mrf.mxu1 }
 0x190   : > { %2387 = vst [vmem:[%s3416_s22 + $0x10] sm:$0xff] %v2334_v29   ;;  %v1801_v39 = vmax.f32 %v1507_v63, %v1718_v46  ;;  %v1859_v19 = vmax.f32 %v1833_v62, 0.0  ;;  %v3556_v61 = vmax.f32 %v3305_v37, %v3307_v38 }
 0x191   : > { %v1429_v12 = vpop.f32.mrf.mxu0  ;;  %v1723_v13 = vpop.f32.mrf.mxu1 }
 0x192   : > { %v1834_v14 = vadd.f32 %v3403_v53, %v1801_v39  ;;  %v1508_v50 = vmax.f32 %v3553_v49, %v1429_v12 }
 0x193   : > { %v2622_v54 = vpop.f32.mrf.mxu0  ;;  %v2684_v9 = vpop.f32.mrf.mxu1 }
 0x194   : > { %v1860_v17 = vmax.f32 %v1834_v14, 0.0  ;;  %v1802_v18 = vmax.f32 %v1508_v50, %v1723_v13  ;;  %v3557_v50 = vmax.f32 %v3311_v42, %v3313_v43 }
 0x195   : > { %v1432_v16 = vpop.f32.mrf.mxu0  ;;  %v1726_v5 = vpop.f32.mrf.mxu1 }
 0x196   : > { %v2339_v2 = vpack.c.bf16 %v1860_v17, %v1859_v19  ;;  %v1509_v57 = vmax.f32 %v3554_v3, %v1432_v16  ;;  %v1835_v56 = vadd.f32 %v3403_v53, %v1802_v18 }
 0x197   : > { %v2623_v58 = vpop.f32.mrf.mxu0  ;;  %v2685_v24 = vpop.f32.mrf.mxu1 }
 0x198   : > { %2388 = vst [vmem:[%s3416_s22 + $0x18] sm:$0xff] %v2339_v2   ;;  %v1803_v47 = vmax.f32 %v1509_v57, %v1726_v5  ;;  %v1861_v29 = vmax.f32 %v1835_v56, 0.0  ;;  %v3558_v2 = vmax.f32 %v3317_v52, %v3319_v55 }
 0x199   : > { %v1437_v22 = vpop.f32.mrf.mxu0  ;;  %v1731_v23 = vpop.f32.mrf.mxu1 }
 0x19a   : > { %v1836_v44 = vadd.f32 %v3403_v53, %v1803_v47  ;;  %v1510_v8 = vmax.f32 %v3555_v7, %v1437_v22  ;;  %v3559_v22 = vmax.f32 %v3323_v0, %v3325_v1 }
 0x19b   : > { %v2626_v45 = vpop.f32.mrf.mxu0  ;;  %v2688_v46 = vpop.f32.mrf.mxu1 }
 0x19c   : > { %v1862_v27 = vmax.f32 %v1836_v44, 0.0  ;;  %v1804_v28 = vmax.f32 %v1510_v8, %v1731_v23 }
 0x19d   : > { %v1440_v35 = vpop.f32.mrf.mxu0  ;;  %v1734_v63 = vpop.f32.mrf.mxu1 }
 0x19e   : > { %v2344_v4 = vpack.c.bf16 %v1862_v27, %v1861_v29  ;;  %v1511_v62 = vmax.f32 %v3556_v61, %v1440_v35  ;;  %v1837_v13 = vadd.f32 %v3403_v53, %v1804_v28  ;;  %v3560_v27 = vmax.f32 %v3329_v11, %v3331_v15 }
 0x19f   : > { %v2627_v39 = vpop.f32.mrf.mxu0  ;;  %v2689_v12 = vpop.f32.mrf.mxu1 }
 0x1a0   : > { %2389 = vst [vmem:[%s3416_s22 + $0x20] sm:$0xff] %v2344_v4   ;;  %v1805_v14 = vmax.f32 %v1511_v62, %v1734_v63  ;;  %v1863_v17 = vmax.f32 %v1837_v13, 0.0  ;;  %v3561_v39 = vmax.f32 %v3335_v25, %v3337_v26 }
 0x1a1   : > { %v1445_v32 = vpop.f32.mrf.mxu0  ;;  %v1739_v33 = vpop.f32.mrf.mxu1 }
 0x1a2   : > { %v1838_v49 = vadd.f32 %v3403_v53, %v1805_v14  ;;  %v1512_v54 = vmax.f32 %v3557_v50, %v1445_v32 }
 0x1a3   : > { %v2630_v9 = vpop.f32.mrf.mxu0  ;;  %v2692_v19 = vpop.f32.mrf.mxu1 }
 0x1a4   : > { %v1864_v37 = vmax.f32 %v1838_v49, 0.0  ;;  %v1806_v38 = vmax.f32 %v1512_v54, %v1739_v33  ;;  %v3562_v54 = vmax.f32 %v3341_v36, %v3343_v40 }
 0x1a5   : > { %v1448_v18 = vpop.f32.mrf.mxu0  ;;  %v1742_v16 = vpop.f32.mrf.mxu1 }
 0x1a6   : > { %v2349_v5 = vpack.c.bf16 %v1864_v37, %v1863_v17  ;;  %v1513_v3 = vmax.f32 %v3558_v2, %v1448_v18  ;;  %v1839_v24 = vadd.f32 %v3403_v53, %v1806_v38 }
 0x1a7   : > { %v2631_v57 = vpop.f32.mrf.mxu0  ;;  %v2693_v58 = vpop.f32.mrf.mxu1 }
 0x1a8   : > { %2390 = vst [vmem:[%s3416_s22 + $0x28] sm:$0xff] %v2349_v5   ;;  %v1807_v56 = vmax.f32 %v1513_v3, %v1742_v16  ;;  %v1865_v8 = vmax.f32 %v1839_v24, 0.0  ;;  %v3563_v16 = vmax.f32 %v3347_v59, %v3349_v60 }
 0x1a9   : > { %v1453_v42 = vpop.f32.mrf.mxu0  ;;  %v1747_v43 = vpop.f32.mrf.mxu1 }
 0x1aa   : > { %v1840_v47 = vadd.f32 %v3403_v53, %v1807_v56  ;;  %v1514_v23 = vmax.f32 %v3559_v22, %v1453_v42  ;;  %v3564_v42 = vmax.f32 %v3353_v21, %v3355_v31 }
 0x1ab   : > { %v2634_v44 = vpop.f32.mrf.mxu0  ;;  %v2696_v7 = vpop.f32.mrf.mxu1 }
 0x1ac   : > { %v1866_v52 = vmax.f32 %v1840_v47, 0.0  ;;  %v1808_v55 = vmax.f32 %v1514_v23, %v1747_v43 }
 0x1ad   : > { %v1456_v45 = vpop.f32.mrf.mxu0  ;;  %v1750_v46 = vpop.f32.mrf.mxu1 }
 0x1ae   : > { %v2354_v29 = vpack.c.bf16 %v1866_v52, %v1865_v8  ;;  %v1515_v28 = vmax.f32 %v3560_v27, %v1456_v45  ;;  %v1841_v4 = vadd.f32 %v3403_v53, %v1808_v55  ;;  %v3565_v8 = vmax.f32 %v3359_v48, %v3361_v51 }
 0x1af   : > { %v2635_v35 = vpop.f32.mrf.mxu0  ;;  %v2697_v63 = vpop.f32.mrf.mxu1 }
 0x1b0   : > { %2391 = vst [vmem:[%s3416_s22 + $0x30] sm:$0xff] %v2354_v29   ;;  %v1809_v61 = vmax.f32 %v1515_v28, %v1750_v46  ;;  %v1867_v32 = vmax.f32 %v1841_v4, 0.0  ;;  %v3566_v35 = vmax.f32 %v3365_v10, %v3367_v20 }
 0x1b1   : > { %v1461_v0 = vpop.f32.mrf.mxu0  ;;  %v1755_v1 = vpop.f32.mrf.mxu1 }
 0x1b2   : > { %v1842_v62 = vadd.f32 %v3403_v53, %v1809_v61  ;;  %v1516_v12 = vmax.f32 %v3561_v39, %v1461_v0  ;;  %v3567_v39 = vmax.f32 %v3371_v30, %v3373_v41 }
 0x1b3   : > { %v2638_v13 = vpop.f32.mrf.mxu0  ;;  %v2700_v14 = vpop.f32.mrf.mxu1 }
 0x1b4   : > { %v1868_v11 = vmax.f32 %v1842_v62, 0.0  ;;  %v1810_v15 = vmax.f32 %v1516_v12, %v1755_v1 }
 0x1b5   : > { %v1464_v33 = vpop.f32.mrf.mxu0  ;;  %v1758_v49 = vpop.f32.mrf.mxu1 }
 0x1b6   : > { %v2359_v50 = vpack.c.bf16 %v1868_v11, %v1867_v32  ;;  %v1517_v9 = vmax.f32 %v3562_v54, %v1464_v33  ;;  %v1843_v37 = vadd.f32 %v3403_v53, %v1810_v15 }
 0x1b7   : > { %v2639_v19 = vpop.f32.mrf.mxu0  ;;  %v2701_v17 = vpop.f32.mrf.mxu1 }
 0x1b8   : > { %2392 = vst [vmem:[%s3416_s22 + $0x38] sm:$0xff] %v2359_v50   ;;  %v1811_v38 = vmax.f32 %v1517_v9, %v1758_v49  ;;  %v1869_v57 = vmax.f32 %v1843_v37, 0.0  ;;  %v3568_v49 = vmax.f32 %v3377_v6, %v3379_v34 }
 0x1b9   : > { %v1469_v25 = vpop.f32.mrf.mxu0  ;;  %v1763_v26 = vpop.f32.mrf.mxu1 }
 0x1ba   : > { %v1844_v18 = vadd.f32 %v3403_v53, %v1811_v38  ;;  %v1518_v5 = vmax.f32 %v3563_v16, %v1469_v25  ;;  %v3569_v38 = vld [vmem:[#allocation3_spill] sm:$0xff]  ;;  %v3570_v25 = vld [vmem:[#allocation4_spill] sm:$0xff] }
 0x1bb   : > { %v2642_v2 = vpop.f32.mrf.mxu0  ;;  %v2704_v3 = vpop.f32.mrf.mxu1 }
 0x1bc   : > { %v1870_v36 = vmax.f32 %v1844_v18, 0.0  ;;  %v1812_v40 = vmax.f32 %v1518_v5, %v1763_v26  ;;  %v3571_v26 = vmax.f32 %v3569_v38, %v3570_v25 }
 0x1bd   : > { %v1472_v58 = vpop.f32.mrf.mxu0  ;;  %v1766_v24 = vpop.f32.mrf.mxu1 }
 0x1be   : > { %v2364_v56 = vpack.c.bf16 %v1870_v36, %v1869_v57  ;;  %v1519_v43 = vmax.f32 %v3564_v42, %v1472_v58  ;;  %v1845_v23 = vadd.f32 %v3403_v53, %v1812_v40  ;;  %v3572_v40 = vld [vmem:[#allocation5_spill] sm:$0xff]  ;;  %v3573_v58 = vld [vmem:[#allocation6_spill] sm:$0xff] }
 0x1bf   : > { %v2643_v47 = vpop.f32.mrf.mxu0  ;;  %v2705_v22 = vpop.f32.mrf.mxu1 }
 0x1c0   : > { %2393 = vst [vmem:[%s3416_s22 + $0x40] sm:$0xff] %v2364_v56   ;;  %v1813_v44 = vmax.f32 %v1519_v43, %v1766_v24  ;;  %v1871_v46 = vmax.f32 %v1845_v23, 0.0  ;;  %v3574_v24 = vmax.f32 %v3572_v40, %v3573_v58 }
 0x1c1   : > { %v1477_v59 = vpop.f32.mrf.mxu0  ;;  %v1771_v60 = vpop.f32.mrf.mxu1 }
 0x1c2   : > { %v1846_v7 = vadd.f32 %v3403_v53, %v1813_v44  ;;  %v1520_v52 = vmax.f32 %v3565_v8, %v1477_v59 }
 0x1c3   : > { %v2646_v55 = vpop.f32.mrf.mxu0  ;;  %v2708_v45 = vpop.f32.mrf.mxu1 }
 0x1c4   : > { %v1872_v21 = vmax.f32 %v1846_v7, 0.0  ;;  %v1814_v31 = vmax.f32 %v1520_v52, %v1771_v60 }
 0x1c5   : > { %v1480_v29 = vpop.f32.mrf.mxu0  ;;  %v1774_v27 = vpop.f32.mrf.mxu1 }
 0x1c6   : > { %v2369_v28 = vpack.c.bf16 %v1872_v21, %v1871_v46  ;;  %v1521_v63 = vmax.f32 %v3566_v35, %v1480_v29  ;;  %v1847_v0 = vadd.f32 %v3403_v53, %v1814_v31 }
 0x1c7   : > { %v2647_v4 = vpop.f32.mrf.mxu0  ;;  %v2709_v61 = vpop.f32.mrf.mxu1 }
 0x1c8   : > { %2394 = vst [vmem:[%s3416_s22 + $0x48] sm:$0xff] %v2369_v28   ;;  %v1815_v1 = vmax.f32 %v1521_v63, %v1774_v27  ;;  %v1873_v32 = vmax.f32 %v1847_v0, 0.0 }
 0x1c9   : > { %v1485_v48 = vpop.f32.mrf.mxu0  ;;  %v1779_v51 = vpop.f32.mrf.mxu1 }
 0x1ca   : > { %v1848_v62 = vadd.f32 %v3403_v53, %v1815_v1  ;;  %v1522_v12 = vmax.f32 %v3567_v39, %v1485_v48 }
 0x1cb   : > { %v2650_v13 = vpop.f32.mrf.mxu0  ;;  %v2712_v14 = vpop.f32.mrf.mxu1 }
 0x1cc   : > { %v1874_v10 = vmax.f32 %v1848_v62, 0.0  ;;  %v1816_v20 = vmax.f32 %v1522_v12, %v1779_v51 }
 0x1cd   : > { %v1488_v11 = vpop.f32.mrf.mxu0  ;;  %v1782_v15 = vpop.f32.mrf.mxu1 }
 0x1ce   : > { %v2374_v33 = vpack.c.bf16 %v1874_v10, %v1873_v32  ;;  %v1523_v50 = vmax.f32 %v3568_v49, %v1488_v11  ;;  %v1849_v19 = vadd.f32 %v3403_v53, %v1816_v20 }
 0x1cf   : > { %v2651_v54 = vpop.f32.mrf.mxu0  ;;  %v2713_v9 = vpop.f32.mrf.mxu1 }
 0x1d0   : > { %2395 = vst [vmem:[%s3416_s22 + $0x50] sm:$0xff] %v2374_v33   ;;  %v1817_v17 = vmax.f32 %v1523_v50, %v1782_v15  ;;  %v1875_v2 = vmax.f32 %v1849_v19, 0.0 }
 0x1d1   : > { %v1493_v30 = vpop.f32.mrf.mxu0  ;;  %v1787_v41 = vpop.f32.mrf.mxu1 }
 0x1d2   : > { %v1850_v37 = vadd.f32 %v3403_v53, %v1817_v17  ;;  %v1524_v18 = vmax.f32 %v3571_v26, %v1493_v30 }
 0x1d3   : > { %v2654_v16 = vpop.f32.mrf.mxu0  ;;  %v2716_v5 = vpop.f32.mrf.mxu1 }
 0x1d4   : > { %v1876_v34 = vmax.f32 %v1850_v37, 0.0  ;;  %v1818_v6 = vmax.f32 %v1524_v18, %v1787_v41 }
 0x1d5   : > { %v1496_v3 = vpop.f32.mrf.mxu0  ;;  %v1790_v57 = vpop.f32.mrf.mxu1 }
 0x1d6   : > { %v2379_v36 = vpack.c.bf16 %v1876_v34, %v1875_v2  ;;  %v1525_v56 = vmax.f32 %v3574_v24, %v1496_v3  ;;  %v1851_v47 = vadd.f32 %v3403_v53, %v1818_v6 }
 0x1d7   : > { %v2655_v42 = vpop.f32.mrf.mxu0  ;;  %v2717_v43 = vpop.f32.mrf.mxu1 }
 0x1d8   : > { %2396 = vst [vmem:[%s3416_s22 + $0x58] sm:$0xff] %v2379_v36   ;;  %v1819_v22 = vmax.f32 %v1525_v56, %v1790_v57  ;;  %v1877_v44 = vmax.f32 %v1851_v47, 0.0 }
 0x1da   : > { %v1852_v23 = vadd.f32 %v3403_v53, %v1819_v22 }
 0x1dc   : > { %v1878_v59 = vmax.f32 %v1852_v23, 0.0 }
 0x1de   : > { %v2384_v60 = vpack.c.bf16 %v1878_v59, %v1877_v44 }
 0x1e0   : > { %2397 = vst [vmem:[%s3416_s22 + $0x60] sm:$0xff] %v2384_v60  }
 0x1e1 PF: > { %p10_p9 = scmp.ge.s32.totalorder %s2866_s16, 4   ;;  %s3575_s12 = smov %s2821_s13 }
 0x1e2   : > { %s3576_s13 = smov %s2875_s19  ;;  %s3577_s14 = smov %s2866_s16 }
 0x1e3   :  { %12 = sbr.rel (!%p10_p9) target bundleno = 2 (0x2), region = 111 }

// kernel: forward.4
= control target key start
LH: loop header
LB: loop body
LE: loop exit
PB: predicated region body
PF: predicated region fallthrough
CT: control target
= control target key end

     0   :  { %s1129_s12 = smov 0   ;;  %s1131_s13 = smov 0   ;;  %s1274_s0 = inlined_call_operand.vmem [shape: bf16[4,96,80], index: 0, kind: input, shape index: {}]   ;;  %s1275_s1 = inlined_call_operand.vmem [shape: bf16[80,128], index: 1, kind: input, shape index: {}]   ;;  %s1276_s2 = inlined_call_operand.vmem [shape: f32[1,128], index: 2, kind: input, shape index: {}]   ;;  %s1277_s3 = inlined_call_operand.vmem [shape: bf16[96,128], index: 3, kind: output, shape index: {}]  }
   0x1   :  { %s1133_s14 = smov 0  }
   0x2 LB: > { %s831_s15 = sadd.s32 4294967295, %s1105_s14   ;;  %s1146_s16 = sadd.s32 1, %s1105_s14   ;;  %s1105_s14 = sphi %s1133_s14, %s1280_s14   ;;  %s1101_s13 = sphi %s1131_s13, %s1279_s13   ;;  %s1097_s12 = sphi %s1129_s12, %s1278_s12  }
   0x3   : > { %s17_s17 = ssub.s32 %s1105_s14, %s1146_s16  ;;  %s20_s18 = sadd.s32 1, %s1101_s13 }
   0x4   : > { %p18_p0 = scmp.eq.s32.totalorder %s17_s17, 0  ;;  %p27_p1 = scmp.ne.s32.totalorder %s1101_s13, %s1097_s12 }
   0x5   : > { %p28_p2 = scmp.eq.s32.totalorder %s1105_s14, 0  ;;  %p834_p4 = scmp.ge.s32.totalorder %s1105_s14, 2 }
   0x6   : > { %s1155_s19 = scalar_select %p18_p0, %s1101_s13, %s20_s18  }
   0x7   : > { %p29_p3 = por %p28_p2, %p27_p1  ;;  %127 = sbr.rel (%p834_p4) target bundleno = 23 (0x17), region = 24 }
   0xc   : > { %130 = sbr.rel (!%p29_p3) target bundleno = 23 (0x17), region = 28  ;;  %s132_s20 = sand.u32 (%p29_p3), 1, %s1101_s13  }
   0xd   : > { %s894_s21 = smul.u32 (%p29_p3), 24, %s1105_s14 }
   0xe   : > { %s1038_s22 = smul.u32 (%p29_p3), 96, %s132_s20 }
   0xf   : > { %s137_s25 = scalar_lea.vmem (%p29_p3), %s1274_s0, %s894_s21 }
  0x10   : > { %v154_v0 = vld [vmem:[%s137_s25] sm:$0xff] (%p29_p3)   ;;  %v158_v1 = vld [vmem:[%s137_s25 + $0x8] sm:$0xff] (%p29_p3)   ;;  %v162_v2 = vld [vmem:[%s137_s25 + $0x10] sm:$0xff] (%p29_p3)   ;;  %s134_s26 = scalar_lea.vmem (%p29_p3), [#allocation2], %s1038_s22 }
  0x11   : > { %155 = vst [vmem:[%s134_s26] sm:$0xff] %v154_v0   ;;  %159 = vst [vmem:[%s134_s26 + $0x8] sm:$0xff] %v158_v1   ;;  %v166_v3 = vld [vmem:[%s137_s25 + $0x30] sm:$0xff]   ;;  %v170_v4 = vld [vmem:[%s137_s25 + $0x38] sm:$0xff]  }
  0x12   : > { %163 = vst [vmem:[%s134_s26 + $0x10] sm:$0xff] %v162_v2   ;;  %v174_v5 = vld [vmem:[%s137_s25 + $0x40] sm:$0xff]   ;;  %167 = vst [vmem:[%s134_s26 + $0x18] sm:$0xff] %v166_v3   ;;  %v182_v7 = vld [vmem:[%s137_s25 + $0x68] sm:$0xff]  }
  0x13   : > { %171 = vst [vmem:[%s134_s26 + $0x20] sm:$0xff] %v170_v4   ;;  %175 = vst [vmem:[%s134_s26 + $0x28] sm:$0xff] %v174_v5   ;;  %v178_v6 = vld [vmem:[%s137_s25 + $0x60] sm:$0xff]   ;;  %v186_v8 = vld [vmem:[%s137_s25 + $0x70] sm:$0xff]  }
  0x14   : > { %179 = vst [vmem:[%s134_s26 + $0x30] sm:$0xff] %v178_v6   ;;  %183 = vst [vmem:[%s134_s26 + $0x38] sm:$0xff] %v182_v7   ;;  %v190_v9 = vld [vmem:[%s137_s25 + $0x90] sm:$0xff]   ;;  %v194_v10 = vld [vmem:[%s137_s25 + $0x98] sm:$0xff]  }
  0x15   : > { %187 = vst [vmem:[%s134_s26 + $0x40] sm:$0xff] %v186_v8   ;;  %v198_v11 = vld [vmem:[%s137_s25 + $0xa0] sm:$0xff]   ;;  %191 = vst [vmem:[%s134_s26 + $0x48] sm:$0xff] %v190_v9  }
  0x16   : > { %195 = vst [vmem:[%s134_s26 + $0x50] sm:$0xff] %v194_v10   ;;  %199 = vst [vmem:[%s134_s26 + $0x58] sm:$0xff] %v198_v11  }
  0x17 PF: > { %p836_p5 = scmp.ge.s32.totalorder %s1105_s14, 1  ;;  %p272_p6 = scmp.lt.s32.totalorder %s1105_s14, 3 }
  0x19   : > { %p273_p7 = pnand %p836_p5, %p272_p6 }
  0x1a   : > { %s279_s4 = sand.u32 (!%p273_p7), 1, %s1097_s12   ;;  %s303_s17 = smul.u32 (!%p273_p7), 6, %s831_s15 }
  0x1b   : > { %276 = sbr.rel (%p273_p7) target bundleno = 301 (0x12d), region = 69 }
  0x1c   : > { %s1039_s5 = smul.u32 (!%p273_p7), 96, %s279_s4  ;;  %p304_p8 = scmp.lt.s32.totalorder (!%p273_p7), %s303_s17, 11 }
  0x1e   : > { %s1183_s8 = scalar_lea.vmem (!%p273_p7), [#allocation2], %s1039_s5 }
  0x20   : > { %v1066_v12 = vld [vmem:[%s1275_s1 + $0x20] sm:$0xff]   ;;  %v1107_v13 = vmov 0.0   ;;  %v1067_v14 = vld [vmem:[%s1275_s1 + $0x18] sm:$0xff]   ;;  %vm1108_vm0 = vmmov 0   ;;  %v1068_v15 = vld [vmem:[%s1275_s1 + $0x10] sm:$0xff]   ;;  %vm371_vm1 = vcmask 654336  }
  0x21   : > { %950 = vmatprep.subr.bf16.mxu0 %v1107_v13  ;;  %972 = vmatprep.subr.bf16.mxu1 %v1107_v13  ;;  %v1069_v16 = vld [vmem:[%s1275_s1 + $0x8] sm:$0xff]   ;;  %v1070_v17 = vld [vmem:[%s1275_s1] sm:$0xff]   ;;  %v1072_v19 = vld [vmem:[%s1183_s8 + $0x18] sm:$0xff]   ;;  %s1282_s17 = smov (!%p304_p8, %s303_s17), 11 }
  0x22   : > { %951 = vmatpush3.bf16.msra.mxu0 %v1066_v12  ;;  %973 = vmatpush3.bf16.msra.mxu1 %v1066_v12  ;;  %v1071_v18 = vld [vmem:[%s1183_s8] sm:$0xff]   ;;  %v1073_v20 = vld [vmem:[%s1183_s8 + $0x8] sm:$0xff]   ;;  %v1075_v22 = vld [vmem:[%s1183_s8 + $0x10] sm:$0xff]   ;;  %s837_s14 = sshll.u32 %s1282_s17, 2 }
  0x23   : > { %952 = vmatprep.subr.bf16.mxu0 %v1107_v13  ;;  %974 = vmatprep.subr.bf16.mxu1 %v1107_v13  ;;  %v1074_v21 = vld [vmem:[%s1183_s8 + $0x20] sm:$0xff]   ;;  %v1076_v23 = vld [vmem:[%s1183_s8 + $0x28] sm:$0xff]   ;;  %v1077_v24 = vld [vmem:[%s1183_s8 + $0x30] sm:$0xff]   ;;  %s1259_s22 = scalar_lea.vmem %s1277_s3, %s837_s14 }
  0x24   : > { %960 = vmatprep.mubr.msk.bf16.mxu0 %vm1108_vm0, %v1107_v13  ;;  %982 = vmatprep.mubr.msk.bf16.mxu1 %vm1108_vm0, %v1107_v13  ;;  %v1078_v25 = vld [vmem:[%s1183_s8 + $0x48] sm:$0xff]   ;;  %v1079_v26 = vld [vmem:[%s1183_s8 + $0x38] sm:$0xff]   ;;  %v1080_v27 = vld [vmem:[%s1183_s8 + $0x50] sm:$0xff]  }
  0x25   : > { %v1081_v28 = vld [vmem:[%s1183_s8 + $0x40] sm:$0xff]   ;;  %v1082_v29 = vld [vmem:[%s1183_s8 + $0x58] sm:$0xff]  }
  0x26   : > { %953 = vmatpush3.bf16.msra.mxu0 %v1067_v14  ;;  %975 = vmatpush3.bf16.msra.mxu1 %v1067_v14  ;;  %v885_v62 = vld [vmem:[%s1276_s2] ss:$0 sm:$0xff] }
  0x27   : > { %954 = vmatprep.subr.bf16.mxu0 %v1107_v13  ;;  %976 = vmatprep.subr.bf16.mxu1 %v1107_v13 }
  0x2a   : > { %955 = vmatpush3.bf16.msra.mxu0 %v1068_v15  ;;  %977 = vmatpush3.bf16.msra.mxu1 %v1068_v15 }
  0x2b   : > { %956 = vmatprep.subr.bf16.mxu0 %v1107_v13  ;;  %978 = vmatprep.subr.bf16.mxu1 %v1107_v13 }
  0x2e   : > { %957 = vmatpush3.bf16.msra.mxu0 %v1069_v16  ;;  %979 = vmatpush3.bf16.msra.mxu1 %v1069_v16 }
  0x2f   : > { %958 = vmatprep.subr.bf16.mxu0 %v1107_v13  ;;  %980 = vmatprep.subr.bf16.mxu1 %v1107_v13 }
  0x32   : > { %959 = vmatpush3.bf16.msra.mxu0 %v1070_v17  ;;  %981 = vmatpush3.bf16.msra.mxu1 %v1070_v17 }
  0x33   : > { %994 = vmatprep.subr.bf16.mxu0 %v1107_v13  ;;  %1016 = vmatprep.subr.bf16.mxu1 %v1107_v13 }
  0x35   : > { %961 = vmatmul.mubr.msk.bf16.vlgmr.msra.gmra.mxu0 %vm371_vm1, %v1071_v18  ;;  %983 = vmatmul.mubr.msk.bf16.vlgmr.msra.gmra.mxu1 %vm371_vm1, %v1072_v19 }
  0x36   : > { %995 = vmatpush3.bf16.msra.mxu0 %v1066_v12  ;;  %1017 = vmatpush3.bf16.msra.mxu1 %v1066_v12 }
  0x37   : > { %996 = vmatprep.subr.bf16.mxu0 %v1107_v13  ;;  %964 = vmatprep.mubr.msk.bf16.mxu0 %vm1108_vm0, %v1107_v13 }
  0x38   : > { %986 = vmatprep.mubr.msk.bf16.mxu1 %vm1108_vm0, %v1107_v13  ;;  %1018 = vmatprep.subr.bf16.mxu1 %v1107_v13 }
  0x3a   : > { %997 = vmatpush3.bf16.msra.mxu0 %v1067_v14  ;;  %1019 = vmatpush3.bf16.msra.mxu1 %v1067_v14 }
  0x3b   : > { %998 = vmatprep.subr.bf16.mxu0 %v1107_v13  ;;  %1020 = vmatprep.subr.bf16.mxu1 %v1107_v13 }
  0x3d   : > { %965 = vmatmul.mubr.msk.bf16.gmra.mxu0 %vm371_vm1, %v1073_v20  ;;  %987 = vmatmul.mubr.msk.bf16.gmra.mxu1 %vm371_vm1, %v1074_v21 }
  0x3e   : > { %999 = vmatpush3.bf16.msra.mxu0 %v1068_v15  ;;  %1021 = vmatpush3.bf16.msra.mxu1 %v1068_v15 }
  0x3f   : > { %968 = vmatprep.mubr.msk.bf16.mxu0 %vm1108_vm0, %v1107_v13  ;;  %990 = vmatprep.mubr.msk.bf16.mxu1 %vm1108_vm0, %v1107_v13 }
  0x40   : > { %1000 = vmatprep.subr.bf16.mxu0 %v1107_v13  ;;  %1022 = vmatprep.subr.bf16.mxu1 %v1107_v13 }
  0x42   : > { %1001 = vmatpush3.bf16.msra.mxu0 %v1069_v16  ;;  %1023 = vmatpush3.bf16.msra.mxu1 %v1069_v16 }
  0x43   : > { %1002 = vmatprep.subr.bf16.mxu0 %v1107_v13  ;;  %1024 = vmatprep.subr.bf16.mxu1 %v1107_v13 }
  0x45   : > { %969 = vmatmul.mubr.msk.bf16.gmra.mxu0 %vm371_vm1, %v1075_v22  ;;  %991 = vmatmul.mubr.msk.bf16.gmra.mxu1 %vm371_vm1, %v1076_v23 }
  0x46   : > { %1003 = vmatpush3.bf16.msra.mxu0 %v1070_v17  ;;  %1025 = vmatpush3.bf16.msra.mxu1 %v1070_v17 }
  0x47   : > { %1004 = vmatprep.mubr.msk.bf16.mxu0 %vm1108_vm0, %v1107_v13  ;;  %1026 = vmatprep.mubr.msk.bf16.mxu1 %vm1108_vm0, %v1107_v13 }
  0x4d   : > { %1005 = vmatmul.mubr.msk.bf16.vlgmr.msra.gmra.mxu0 %vm371_vm1, %v1077_v24  ;;  %1027 = vmatmul.mubr.msk.bf16.vlgmr.msra.gmra.mxu1 %vm371_vm1, %v1078_v25 }
  0x4e   : > { %1008 = vmatprep.mubr.msk.bf16.mxu0 %vm1108_vm0, %v1107_v13  ;;  %1030 = vmatprep.mubr.msk.bf16.mxu1 %vm1108_vm0, %v1107_v13 }
  0x55   : > { %1009 = vmatmul.mubr.msk.bf16.gmra.mxu0 %vm371_vm1, %v1079_v26  ;;  %1031 = vmatmul.mubr.msk.bf16.gmra.mxu1 %vm371_vm1, %v1080_v27 }
  0x56   : > { %1012 = vmatprep.mubr.msk.bf16.mxu0 %vm1108_vm0, %v1107_v13  ;;  %1034 = vmatprep.mubr.msk.bf16.mxu1 %vm1108_vm0, %v1107_v13 }
  0x5d   : > { %1013 = vmatmul.mubr.msk.bf16.gmra.mxu0 %vm371_vm1, %v1081_v28  ;;  %1035 = vmatmul.mubr.msk.bf16.gmra.mxu1 %vm371_vm1, %v1082_v29 }
  0xf5   : > { %v415_v30 = vpop.f32.mrf.mxu0  ;;  %v503_v31 = vpop.f32.mrf.mxu1 }
  0xf6   : > { %v526_v54 = vmax.f32 %v415_v30, %v503_v31 }
  0xf7   : > { %v962_v32 = vpop.f32.mrf.mxu0  ;;  %v984_v33 = vpop.f32.mrf.mxu1 }
  0xf9   : > { %v418_v34 = vpop.f32.mrf.mxu0  ;;  %v506_v35 = vpop.f32.mrf.mxu1 }
  0xfa   : > { %v527_v60 = vmax.f32 %v418_v34, %v506_v35 }
  0xfb   : > { %v963_v36 = vpop.f32.mrf.mxu0  ;;  %v985_v37 = vpop.f32.mrf.mxu1 }
  0xfd   : > { %v423_v38 = vpop.f32.mrf.mxu0  ;;  %v511_v39 = vpop.f32.mrf.mxu1 }
  0xfe   : > { %v528_v4 = vmax.f32 %v423_v38, %v511_v39 }
  0xff   : > { %v966_v40 = vpop.f32.mrf.mxu0  ;;  %v988_v41 = vpop.f32.mrf.mxu1 }
 0x101   : > { %v426_v42 = vpop.f32.mrf.mxu0  ;;  %v514_v43 = vpop.f32.mrf.mxu1 }
 0x102   : > { %v529_v13 = vmax.f32 %v426_v42, %v514_v43 }
 0x103   : > { %v967_v44 = vpop.f32.mrf.mxu0  ;;  %v989_v45 = vpop.f32.mrf.mxu1 }
 0x105   : > { %v431_v46 = vpop.f32.mrf.mxu0  ;;  %v519_v47 = vpop.f32.mrf.mxu1 }
 0x106   : > { %v530_v23 = vmax.f32 %v431_v46, %v519_v47 }
 0x107   : > { %v970_v48 = vpop.f32.mrf.mxu0  ;;  %v992_v49 = vpop.f32.mrf.mxu1 }
 0x109   : > { %v434_v50 = vpop.f32.mrf.mxu0  ;;  %v522_v51 = vpop.f32.mrf.mxu1 }
 0x10a   : > { %v531_v32 = vmax.f32 %v434_v50, %v522_v51 }
 0x10b   : > { %v971_v52 = vpop.f32.mrf.mxu0  ;;  %v993_v53 = vpop.f32.mrf.mxu1 }
 0x10d   : > { %v597_v55 = vpop.f32.mrf.mxu0  ;;  %v691_v56 = vpop.f32.mrf.mxu1 }
 0x10e   : > { %v620_v57 = vmax.f32 %v526_v54, %v597_v55 }
 0x10f   : > { %v1006_v58 = vpop.f32.mrf.mxu0  ;;  %v1028_v59 = vpop.f32.mrf.mxu1 }
 0x110   : > { %v714_v61 = vmax.f32 %v620_v57, %v691_v56 }
 0x111   : > { %v600_v63 = vpop.f32.mrf.mxu0  ;;  %v694_v0 = vpop.f32.mrf.mxu1 }
 0x112   : > { %v621_v1 = vmax.f32 %v527_v60, %v600_v63  ;;  %v727_v5 = vadd.f32 %v885_v62, %v714_v61 }
 0x113   : > { %v1007_v2 = vpop.f32.mrf.mxu0  ;;  %v1029_v3 = vpop.f32.mrf.mxu1 }
 0x114   : > { %v715_v6 = vmax.f32 %v621_v1, %v694_v0  ;;  %v733_v14 = vmax.f32 %v727_v5, 0.0 }
 0x115   : > { %v605_v7 = vpop.f32.mrf.mxu0  ;;  %v699_v8 = vpop.f32.mrf.mxu1 }
 0x116   : > { %v728_v9 = vadd.f32 %v885_v62, %v715_v6  ;;  %v622_v10 = vmax.f32 %v528_v4, %v605_v7 }
 0x117   : > { %v1010_v11 = vpop.f32.mrf.mxu0  ;;  %v1032_v12 = vpop.f32.mrf.mxu1 }
 0x118   : > { %v734_v15 = vmax.f32 %v728_v9, 0.0  ;;  %v716_v16 = vmax.f32 %v622_v10, %v699_v8 }
 0x119   : > { %v608_v17 = vpop.f32.mrf.mxu0  ;;  %v702_v18 = vpop.f32.mrf.mxu1 }
 0x11a   : > { %v904_v19 = vpack.c.bf16 %v734_v15, %v733_v14  ;;  %v623_v20 = vmax.f32 %v529_v13, %v608_v17  ;;  %v729_v24 = vadd.f32 %v885_v62, %v716_v16 }
 0x11b   : > { %v1011_v21 = vpop.f32.mrf.mxu0  ;;  %v1033_v22 = vpop.f32.mrf.mxu1 }
 0x11c   : > { %905 = vst [vmem:[%s1259_s22] sm:$0xff] %v904_v19   ;;  %v717_v25 = vmax.f32 %v623_v20, %v702_v18  ;;  %v735_v33 = vmax.f32 %v729_v24, 0.0 }
 0x11d   : > { %v613_v26 = vpop.f32.mrf.mxu0  ;;  %v707_v27 = vpop.f32.mrf.mxu1 }
 0x11e   : > { %v730_v28 = vadd.f32 %v885_v62, %v717_v25  ;;  %v624_v29 = vmax.f32 %v530_v23, %v613_v26 }
 0x11f   : > { %v1014_v30 = vpop.f32.mrf.mxu0  ;;  %v1036_v31 = vpop.f32.mrf.mxu1 }
 0x120   : > { %v736_v34 = vmax.f32 %v730_v28, 0.0  ;;  %v718_v35 = vmax.f32 %v624_v29, %v707_v27 }
 0x121   : > { %v616_v36 = vpop.f32.mrf.mxu0  ;;  %v710_v37 = vpop.f32.mrf.mxu1 }
 0x122   : > { %v909_v38 = vpack.c.bf16 %v736_v34, %v735_v33  ;;  %v625_v39 = vmax.f32 %v531_v32, %v616_v36  ;;  %v731_v42 = vadd.f32 %v885_v62, %v718_v35 }
 0x123   : > { %v1015_v40 = vpop.f32.mrf.mxu0  ;;  %v1037_v41 = vpop.f32.mrf.mxu1 }
 0x124   : > { %916 = vst [vmem:[%s1259_s22 + $0x8] sm:$0xff] %v909_v38   ;;  %v719_v43 = vmax.f32 %v625_v39, %v710_v37  ;;  %v737_v45 = vmax.f32 %v731_v42, 0.0 }
 0x126   : > { %v732_v44 = vadd.f32 %v885_v62, %v719_v43 }
 0x128   : > { %v738_v46 = vmax.f32 %v732_v44, 0.0 }
 0x12a   : > { %v914_v47 = vpack.c.bf16 %v738_v46, %v737_v45 }
 0x12c   : > { %917 = vst [vmem:[%s1259_s22 + $0x10] sm:$0xff] %v914_v47  }
 0x12d PF: > { %p10_p9 = scmp.ge.s32.totalorder %s1146_s16, 4   ;;  %s1278_s12 = smov %s1101_s13 }
 0x12e   : > { %s1279_s13 = smov %s1155_s19  ;;  %s1280_s14 = smov %s1146_s16 }
 0x12f   :  { %12 = sbr.rel (!%p10_p9) target bundleno = 2 (0x2), region = 111 }

// kernel: forward.5
= control target key start
LH: loop header
LB: loop body
LE: loop exit
PB: predicated region body
PF: predicated region fallthrough
CT: control target
= control target key end

     0   :  { %v992_v33 = vmov 0.0   ;;  %vm993_vm0 = vmmov 0   ;;  %vm353_vm1 = vcmask 523264   ;;  %s1246_s1 = inlined_call_operand.vmem [shape: bf16[576,128], index: 1, kind: input, shape index: {}]   ;;  %s1247_s0 = inlined_call_operand.vmem [shape: bf16[16,576], index: 0, kind: input, shape index: {}]   ;;  %s1248_s3 = inlined_call_operand.vmem [shape: bf16[128,128], index: 3, kind: input, shape index: {}]   ;;  %s1249_s5 = inlined_call_operand.vmem [shape: bf16[128,128], index: 5, kind: input, shape index: {}]   ;;  %s1250_s2 = inlined_call_operand.vmem [shape: f32[1,128], index: 2, kind: input, shape index: {}]   ;;  %s1251_s4 = inlined_call_operand.vmem [shape: f32[1,128], index: 4, kind: input, shape index: {}]   ;;  %s1252_s6 = inlined_call_operand.vmem [shape: f32[1,128], index: 6, kind: input, shape index: {}]   ;;  %s1253_s7 = inlined_call_operand.vmem [shape: f32[16,128], index: 7, kind: output, shape index: {}]  }
   0x1   :  { %v925_v0 = vld [vmem:[%s1246_s1 + $0x78] sm:$0xff]   ;;  %v929_v4 = vld [vmem:[%s1246_s1 + $0x70] sm:$0xff]   ;;  %v933_v8 = vld [vmem:[%s1246_s1 + $0x68] sm:$0xff]  }
   0x2   :  { %v926_v1 = vld [vmem:[%s1246_s1 + $0x38] sm:$0xff]   ;;  %804 = vmatprep.subr.bf16.mxu0 %v925_v0  ;;  %v930_v5 = vld [vmem:[%s1246_s1 + $0x30] sm:$0xff]   ;;  %v934_v9 = vld [vmem:[%s1246_s1 + $0x28] sm:$0xff]  }
   0x3   :  { %v927_v2 = vld [vmem:[%s1246_s1 + $0xf8] sm:$0xff]   ;;  %805 = vmatpush3.bf16.msra.mxu0 %v926_v1  ;;  %v931_v6 = vld [vmem:[%s1246_s1 + $0xf0] sm:$0xff]   ;;  %v935_v10 = vld [vmem:[%s1246_s1 + $0xe8] sm:$0xff]  }
   0x4   :  { %v928_v3 = vld [vmem:[%s1246_s1 + $0xb8] sm:$0xff]   ;;  %826 = vmatprep.subr.bf16.mxu1 %v927_v2  ;;  %806 = vmatprep.subr.bf16.mxu0 %v929_v4  ;;  %v932_v7 = vld [vmem:[%s1246_s1 + $0xb0] sm:$0xff]   ;;  %v936_v11 = vld [vmem:[%s1246_s1 + $0xa8] sm:$0xff]  }
   0x5   :  { %827 = vmatpush3.bf16.msra.mxu1 %v928_v3  ;;  %v937_v12 = vld [vmem:[%s1246_s1 + $0x60] sm:$0xff]   ;;  %v941_v16 = vld [vmem:[%s1246_s1 + $0x58] sm:$0xff]   ;;  %v945_v20 = vld [vmem:[%s1246_s1 + $0x50] sm:$0xff]  }
   0x6   :  { %828 = vmatprep.subr.bf16.mxu1 %v931_v6  ;;  %v938_v13 = vld [vmem:[%s1246_s1 + $0x20] sm:$0xff]   ;;  %v942_v17 = vld [vmem:[%s1246_s1 + $0x18] sm:$0xff]   ;;  %v946_v21 = vld [vmem:[%s1246_s1 + $0x10] sm:$0xff]  }
   0x7   :  { %807 = vmatpush3.bf16.msra.mxu0 %v930_v5  ;;  %v939_v14 = vld [vmem:[%s1246_s1 + $0xe0] sm:$0xff]   ;;  %v943_v18 = vld [vmem:[%s1246_s1 + $0xd8] sm:$0xff]   ;;  %v947_v22 = vld [vmem:[%s1246_s1 + $0xd0] sm:$0xff]  }
   0x8   :  { %808 = vmatprep.subr.bf16.mxu0 %v933_v8  ;;  %v940_v15 = vld [vmem:[%s1246_s1 + $0xa0] sm:$0xff]   ;;  %v944_v19 = vld [vmem:[%s1246_s1 + $0x98] sm:$0xff]   ;;  %v948_v23 = vld [vmem:[%s1246_s1 + $0x90] sm:$0xff]  }
   0x9   :  { %829 = vmatpush3.bf16.msra.mxu1 %v932_v7  ;;  %v949_v24 = vld [vmem:[%s1246_s1 + $0x48] sm:$0xff]   ;;  %v953_v28 = vld [vmem:[%s1246_s1 + $0x40] sm:$0xff]   ;;  %v963_v37 = vld [vmem:[%s1246_s1 + $0x118] sm:$0xff]  }
   0xa   :  { %830 = vmatprep.subr.bf16.mxu1 %v935_v10  ;;  %v950_v25 = vld [vmem:[%s1246_s1 + $0x8] sm:$0xff]   ;;  %v954_v29 = vld [vmem:[%s1246_s1] sm:$0xff]   ;;  %v964_v38 = vld [vmem:[%s1246_s1 + $0x110] sm:$0xff]  }
   0xb   :  { %809 = vmatpush3.bf16.msra.mxu0 %v934_v9  ;;  %v951_v26 = vld [vmem:[%s1246_s1 + $0xc8] sm:$0xff]   ;;  %v955_v30 = vld [vmem:[%s1246_s1 + $0xc0] sm:$0xff]   ;;  %v968_v40 = vld [vmem:[%s1248_s3 + $0x38] sm:$0xff]  }
   0xc   :  { %810 = vmatprep.subr.bf16.mxu0 %v937_v12  ;;  %v952_v27 = vld [vmem:[%s1246_s1 + $0x88] sm:$0xff]   ;;  %v956_v31 = vld [vmem:[%s1247_s0] ss:$20 sps:$4 sm:$0xff]   ;;  %v958_v32 = vld [vmem:[%s1247_s0 + $0x4] ss:$20 sps:$4 sm:$0xff]  }
   0xd   :  { %831 = vmatpush3.bf16.msra.mxu1 %v936_v11  ;;  %v959_v34 = vld [vmem:[%s1246_s1 + $0x80] sm:$0xff]   ;;  %389 = vmatprep.mubr.bf16.mxu0 %v958_v32  ;;  %v960_v35 = vld [vmem:[%s1247_s0 + $0x8] ss:$20 sps:$4 sm:$0xff]   ;;  %v969_v43 = vld [vmem:[%s1248_s3 + $0x30] sm:$0xff]  }
   0xe   :  { %832 = vmatprep.subr.bf16.mxu1 %v939_v14  ;;  %v962_v36 = vld [vmem:[%s1247_s0 + $0xc] ss:$20 sps:$4 sm:$0xff]   ;;  %v967_v42 = vld [vmem:[%s1247_s0 + $0x10] ss:$20 sps:$4 sm:$0xff]   ;;  %v972_v46 = vld [vmem:[%s1248_s3 + $0x18] sm:$0xff]  }
   0xf   :  { %811 = vmatpush3.bf16.msra.mxu0 %v938_v13  ;;  %430 = vmatprep.mubr.bf16.mxu1 %v962_v36  ;;  %v965_v39 = vld [vmem:[%s1246_s1 + $0x108] sm:$0xff]   ;;  %v966_v41 = vld [vmem:[%s1246_s1 + $0x100] sm:$0xff]   ;;  %v973_v47 = vld [vmem:[%s1248_s3 + $0x10] sm:$0xff]  }
  0x10   :  { %812 = vmatprep.subr.bf16.mxu0 %v941_v16  ;;  %v970_v44 = vld [vmem:[%s1248_s3 + $0x28] sm:$0xff]   ;;  %v971_v45 = vld [vmem:[%s1248_s3 + $0x20] sm:$0xff]   ;;  %v976_v50 = vld [vmem:[%s1249_s5 + $0x38] sm:$0xff]  }
  0x11   :  { %833 = vmatpush3.bf16.msra.mxu1 %v940_v15  ;;  %v974_v48 = vld [vmem:[%s1248_s3 + $0x8] sm:$0xff]   ;;  %v975_v49 = vld [vmem:[%s1248_s3] sm:$0xff]   ;;  %v977_v51 = vld [vmem:[%s1249_s5 + $0x30] sm:$0xff]  }
  0x12   :  { %834 = vmatprep.subr.bf16.mxu1 %v943_v18  ;;  %v978_v52 = vld [vmem:[%s1249_s5 + $0x28] sm:$0xff]   ;;  %v979_v53 = vld [vmem:[%s1249_s5 + $0x20] sm:$0xff]   ;;  %v980_v54 = vld [vmem:[%s1249_s5 + $0x18] sm:$0xff]  }
  0x13   :  { %813 = vmatpush3.bf16.msra.mxu0 %v942_v17  ;;  %v743_v63 = vld [vmem:[%s1250_s2] ss:$0 sm:$0xff]  ;;  %v981_v17 = vld [vmem:[%s1249_s5 + $0x10] sm:$0xff]   ;;  %v982_v18 = vld [vmem:[%s1249_s5 + $0x8] sm:$0xff]  }
  0x14   :  { %814 = vmatprep.subr.bf16.mxu0 %v945_v20  ;;  %v786_v20 = vld [vmem:[%s1251_s4] ss:$0 sm:$0xff] }
  0x15   :  { %835 = vmatpush3.bf16.msra.mxu1 %v944_v19  ;;  %v983_v19 = vld [vmem:[%s1249_s5] sm:$0xff]  }
  0x16   :  { %836 = vmatprep.subr.bf16.mxu1 %v947_v22  ;;  %v795_v32 = vld [vmem:[%s1252_s6] ss:$0 sm:$0xff] }
  0x17   :  { %815 = vmatpush3.bf16.msra.mxu0 %v946_v21 }
  0x18   :  { %816 = vmatprep.subr.bf16.mxu0 %v949_v24 }
  0x19   :  { %837 = vmatpush3.bf16.msra.mxu1 %v948_v23 }
  0x1a   :  { %838 = vmatprep.subr.bf16.mxu1 %v951_v26 }
  0x1b   :  { %817 = vmatpush3.bf16.msra.mxu0 %v950_v25 }
  0x1c   :  { %818 = vmatprep.subr.bf16.mxu0 %v953_v28 }
  0x1d   :  { %839 = vmatpush3.bf16.msra.mxu1 %v952_v27 }
  0x1e   :  { %840 = vmatprep.subr.bf16.mxu1 %v955_v30  ;;  %v710_v30 = vlaneseq }
  0x1f   :  { %819 = vmatpush3.bf16.msra.mxu0 %v954_v29 }
  0x20   :  { %871 = vmatprep.subr.bf16.mxu0 %v992_v33 }
  0x21   :  { %841 = vmatpush3.bf16.msra.mxu1 %v959_v34 }
  0x22   :  { %390 = vmatmul.mubr.bf16.vlgmr.msra.gmra.mxu0 %v956_v31  ;;  %883 = vmatprep.subr.bf16.mxu1 %v992_v33  ;;  %v711_v31 = vand.u32 127, %v710_v30 }
  0x23   :  { %879 = vmatprep.mubr.msk.bf16.mxu0 %vm993_vm0, %v992_v33  ;;  %872 = vmatpush3.bf16.msra.mxu0 %v963_v37 }
  0x24   :  { %431 = vmatmul.mubr.bf16.vlgmr.msra.gmra.mxu1 %v960_v35  ;;  %873 = vmatprep.subr.bf16.mxu0 %v992_v33  ;;  %vm712_vm2 = vcmp.lt.s32.totalorder %v711_v31, 10 }
  0x25   :  { %899 = vmatprep.mubr.msk.bf16.mxu1 %vm993_vm0, %v992_v33  ;;  %884 = vmatpush3.bf16.msra.mxu1 %v968_v40 }
  0x26   :  { %885 = vmatprep.subr.bf16.mxu1 %v992_v33 }
  0x27   :  { %874 = vmatpush3.bf16.msra.mxu0 %v964_v38 }
  0x28   :  { %875 = vmatprep.subr.bf16.mxu0 %v992_v33 }
  0x29   :  { %886 = vmatpush3.bf16.msra.mxu1 %v969_v43 }
  0x2a   :  { %887 = vmatprep.subr.bf16.mxu1 %v992_v33 }
  0x2b   :  { %876 = vmatpush3.bf16.msra.mxu0 %v965_v39 }
  0x2c   :  { %877 = vmatprep.subr.bf16.mxu0 %v992_v33 }
  0x2d   :  { %888 = vmatpush3.bf16.msra.mxu1 %v970_v44 }
  0x2e   :  { %889 = vmatprep.subr.bf16.mxu1 %v992_v33 }
  0x2f   :  { %878 = vmatpush3.bf16.msra.mxu0 %v966_v41 }
  0x30   :  { %903 = vmatprep.subr.bf16.mxu0 %v992_v33 }
  0x31   :  { %890 = vmatpush3.bf16.msra.mxu1 %v971_v45 }
  0x32   :  { %880 = vmatmul.mubr.msk.bf16.vlgmr.msra.gmra.mxu0 %vm353_vm1, %v967_v42  ;;  %891 = vmatprep.subr.bf16.mxu1 %v992_v33 }
  0x33   :  { %919 = vmatprep.mubr.msk.bf16.mxu0 %vm993_vm0, %v992_v33  ;;  %904 = vmatpush3.bf16.msra.mxu0 %v976_v50 }
  0x34   :  { %905 = vmatprep.subr.bf16.mxu0 %v992_v33 }
  0x35   :  { %892 = vmatpush3.bf16.msra.mxu1 %v972_v46 }
  0x36   :  { %893 = vmatprep.subr.bf16.mxu1 %v992_v33 }
  0x37   :  { %906 = vmatpush3.bf16.msra.mxu0 %v977_v51 }
  0x38   :  { %907 = vmatprep.subr.bf16.mxu0 %v992_v33 }
  0x39   :  { %894 = vmatpush3.bf16.msra.mxu1 %v973_v47 }
  0x3a   :  { %895 = vmatprep.subr.bf16.mxu1 %v992_v33 }
  0x3b   :  { %908 = vmatpush3.bf16.msra.mxu0 %v978_v52 }
  0x3c   :  { %909 = vmatprep.subr.bf16.mxu0 %v992_v33 }
  0x3d   :  { %896 = vmatpush3.bf16.msra.mxu1 %v974_v48 }
  0x3e   :  { %897 = vmatprep.subr.bf16.mxu1 %v992_v33 }
  0x3f   :  { %910 = vmatpush3.bf16.msra.mxu0 %v979_v53 }
  0x40   :  { %911 = vmatprep.subr.bf16.mxu0 %v992_v33 }
  0x41   :  { %898 = vmatpush3.bf16.msra.mxu1 %v975_v49 }
  0x43   :  { %912 = vmatpush3.bf16.msra.mxu0 %v980_v54 }
  0x44   :  { %913 = vmatprep.subr.bf16.mxu0 %v992_v33 }
  0x47   :  { %914 = vmatpush3.bf16.msra.mxu0 %v981_v17 }
  0x48   :  { %915 = vmatprep.subr.bf16.mxu0 %v992_v33 }
  0x4b   :  { %916 = vmatpush3.bf16.msra.mxu0 %v982_v18 }
  0x4c   :  { %917 = vmatprep.subr.bf16.mxu0 %v992_v33 }
  0x4f   :  { %918 = vmatpush3.bf16.msra.mxu0 %v983_v19 }
  0xe2   :  { %v820_v55 = vpop.f32.mrf.mxu0 }
  0xe4   :  { %v821_v56 = vpop.f32.mrf.mxu0  ;;  %v842_v57 = vpop.f32.mrf.mxu1 }
  0xe5   :  { %v822_v62 = vadd.f32 %v821_v56, %v820_v55 }
  0xe6   :  { %v823_v58 = vpop.f32.mrf.mxu0  ;;  %v843_v59 = vpop.f32.mrf.mxu1 }
  0xe7   :  { %v392_v2 = vadd.f32 %v822_v62, %v743_v63  ;;  %v844_v3 = vadd.f32 %v843_v59, %v842_v57 }
  0xe8   :  { %v824_v60 = vpop.f32.mrf.mxu0  ;;  %v845_v61 = vpop.f32.mrf.mxu1 }
  0xe9   :  { %v825_v0 = vadd.f32 %v824_v60, %v823_v58  ;;  %v433_v7 = vadd.f32 %v844_v3, %v392_v2 }
  0xea   :  { %v846_v1 = vpop.f32.mrf.mxu1 }
  0xeb   :  { %v395_v4 = vadd.f32 %v825_v0, %v743_v63  ;;  %v847_v5 = vadd.f32 %v846_v1, %v845_v61 }
  0xed   :  { %v436_v10 = vadd.f32 %v847_v5, %v395_v4 }
  0xf2   :  { %v473_v6 = vpop.f32.mrf.mxu0 }
  0xf3   :  { %v474_v9 = vadd.f32 %v473_v6, %v433_v7 }
  0xf4   :  { %v881_v8 = vpop.f32.mrf.mxu0 }
  0xf5   :  { %v480_v14 = vmax.f32 %v474_v9, 0.0 }
  0xf6   :  { %v476_v11 = vpop.f32.mrf.mxu0 }
  0xf7   :  { %v477_v12 = vadd.f32 %v476_v11, %v436_v10 }
  0xf8   :  { %v882_v13 = vpop.f32.mrf.mxu0 }
  0xf9   :  { %v481_v15 = vmax.f32 %v477_v12, 0.0 }
  0xfb   :  { %v482_v16 = vpack.c.bf16 %v481_v15, %v480_v14 }
  0xfd   :  { %900 = vmatmul.mubr.bf16.vlgmr.msra.gmra.mxu1 %v482_v16 }
 0x1bd   :  { %v588_v21 = vpop.f32.mrf.mxu1 }
 0x1be   :  { %v589_v23 = vadd.f32 %v786_v20, %v588_v21 }
 0x1bf   :  { %v901_v22 = vpop.f32.mrf.mxu1 }
 0x1c0   :  { %v595_v27 = vmax.f32 %v589_v23, 0.0 }
 0x1c1   :  { %v591_v24 = vpop.f32.mrf.mxu1 }
 0x1c2   :  { %v592_v25 = vadd.f32 %v786_v20, %v591_v24 }
 0x1c3   :  { %v902_v26 = vpop.f32.mrf.mxu1 }
 0x1c4   :  { %v596_v28 = vmax.f32 %v592_v25, 0.0 }
 0x1c6   :  { %v597_v29 = vpack.c.bf16 %v596_v28, %v595_v27 }
 0x1c8   :  { %920 = vmatmul.mubr.bf16.vlgmr.msra.gmra.mxu0 %v597_v29 }
 0x288   :  { %v703_v33 = vpop.f32.mrf.mxu0 }
 0x289   :  { %v704_v34 = vadd.f32 %v795_v32, %v703_v33 }
 0x28a   :  { %v921_v35 = vpop.f32.mrf.mxu0 }
 0x28b   :  { %v713_v36 = vsel %vm712_vm2, %v704_v34, -1e+30 }
 0x28c   :  { %715 = vmax.xlane.f32.xlu0 %v713_v36  ;;  %v706_v37 = vpop.f32.mrf.mxu0 }
 0x28d   :  { %v707_v38 = vadd.f32 %v795_v32, %v706_v37 }
 0x28e   :  { %v922_v39 = vpop.f32.mrf.mxu0 }
 0x28f   :  { %v714_v40 = vsel %vm712_vm2, %v707_v38, -1e+30 }
 0x290   :  { %717 = vmax.xlane.f32.xlu0 %v714_v40 }
 0x315   :  { %v716_v41 = vpop.xlane.xlu0 %715 }
 0x316   :  { %v719_v42 = vsub.f32 %v713_v36, %v716_v41 }
 0x318   :  { %v721_v43 = vmul.f32 1.442695, %v719_v42 }
 0x319   :  { %v718_v44 = vpop.xlane.xlu0 %717 }
 0x31a   :  { %984 = vpow2.f32 %v721_v43  ;;  %v720_v45 = vsub.f32 %v714_v40, %v718_v44 }
 0x31c   :  { %v723_v46 = vmul.f32 1.442695, %v720_v45 }
 0x31e   :  { %986 = vpow2.f32 %v723_v46 }
 0x327   :  { %v985_v47 = vpop.eup %984 }
 0x328   :  { %725 = vadd.xlane.f32.xlu1 %v985_v47 }
 0x32b   :  { %v987_v48 = vpop.eup %986 }
 0x32c   :  { %727 = vadd.xlane.f32.xlu1 %v987_v48 }
 0x3b1   :  { %v726_v49 = vpop.xlane.xlu1 %725 }
 0x3b2   :  { %988 = vlog2.f32 %v726_v49 }
 0x3b5   :  { %v728_v50 = vpop.xlane.xlu1 %727 }
 0x3b6   :  { %990 = vlog2.f32 %v728_v50 }
 0x3bf   :  { %v989_v51 = vpop.eup %988 }
 0x3c0   :  { %v730_v52 = vmul.f32 0.6931472, %v989_v51 }
 0x3c2   :  { %v733_v53 = vadd.f32 %v730_v52, %v716_v41 }
 0x3c3   :  { %v991_v54 = vpop.eup %990 }
 0x3c4   :  { %v735_v55 = vsub.f32 %v713_v36, %v733_v53  ;;  %v732_v56 = vmul.f32 0.6931472, %v991_v54 }
 0x3c6   :  { %737 = vst [vmem:[%s1253_s7] sm:$0xff] %v735_v55  ;;  %v734_v57 = vadd.f32 %v732_v56, %v718_v44 }
 0x3c8   :  { %v736_v58 = vsub.f32 %v714_v40, %v734_v57 }
 0x3ca   :  { %738 = vst [vmem:[%s1253_s7 + $0x8] sm:$0xff] %v736_v58 }

</bundles_post_ra>
